<compile_context>
chip_gen: v7x
topology: tpu7x:2x2x1
jax: 0.10.0
libtpu: 0.0.40
codegen_flags: <defaults>
</compile_context>

<pallas_src>
import jax
import jax.numpy as jnp
import numpy as np
from jax.experimental import pallas as pl
from jax.experimental.pallas import tpu as pltpu


def _round_up(v, m=128):
    return ((v + m - 1) // m) * m


# ----------------------------- Pallas kernel ------------------------------- #

def make_sage_fused_kernel(num_layers, t_rows, cp):
    """Fused: L x (mean-agg SAGEConv + BN(eval) + ReLU) + cluster tail + fc1."""

    def kernel(a_ref, xin_ref, invd_ref, w_ref, s_ref, sp_ref,
               wtop_ref, wbot_ref, fcb_ref, o_ref, hin_ref):
        a = a_ref[...]                      # [N, N]  bf16 integer edge counts (exact)
        inv_deg = invd_ref[...]             # [N, 1]  f32 1/in-degree (kept out of A)
        # seed the "x" half of the merged [agg | x] operand
        hin_ref[:, cp:] = xin_ref[...]

        for li in range(num_layers):        # statically unrolled
            x_cur = hin_ref[:, cp:]         # previous layer's bf16 activations
            # mean aggregation: bf16 MXU matmul, f32 acc, f32 row-scale on the VPU
            agg = jnp.dot(a, x_cur, preferred_element_type=jnp.float32) * inv_deg
            hin_ref[:, :cp] = agg.astype(jnp.bfloat16)
            # merged projection [agg | x] @ [Wl; Wr]: single K=2*CP bf16 matmul
            # (fills v6e/v7x 256-deep MXU; lane offsets 0 and CP are 128-aligned)
            h = jnp.dot(hin_ref[...], w_ref[li],
                        preferred_element_type=jnp.float32) + s_ref[li]
            # BN(eval) scale/bias folded into w_ref/s_ref; ReLU; dropout = identity
            # (eval). ReLU output goes straight back into the merged operand.
            hin_ref[:, cp:] = jnp.maximum(h, 0.0).astype(jnp.bfloat16)

        # tail: [xt; x1] via ONE [2T,N]x[N,CP] matmul (sel & p_mat stacked host-side)
        x_fin = hin_ref[:, cp:]
        stacked = jnp.dot(sp_ref[...], x_fin,
                          preferred_element_type=jnp.float32)          # [2T, CP]
        stacked_b = stacked.astype(jnp.bfloat16)
        # [x1; xt] = sublane roll by T (T multiple of 8) -> XLU slot, free
        rolled_b = pltpu.roll(stacked, shift=t_rows, axis=0).astype(jnp.bfloat16)
        # fc1 on cat([[xt,x1],[x1,xt]],0) without materializing the concat:
        # two [2T,CP]x[CP,FP] bf16 matmuls + one full lane-dense f32 store.
        o_ref[...] = (jnp.dot(stacked_b, wtop_ref[...],
                              preferred_element_type=jnp.float32)
                      + jnp.dot(rolled_b, wbot_ref[...],
                                preferred_element_type=jnp.float32)
                      + fcb_ref[...])

    return kernel


def sage_fused_call(a_bf, x_bf, inv_deg, w_all, s_all, sp, w_top, w_bot, fc_b):
    n, cp = x_bf.shape
    num_layers = int(w_all.shape[0])
    t2 = int(sp.shape[0])
    fp = int(w_top.shape[1])
    kernel = make_sage_fused_kernel(num_layers, t2 // 2, cp)
    # Single invocation, everything VMEM-resident (demo scale): default full-array
    # blocks, one bf16 scratch for the merged [agg | x] operand.
    return pl.pallas_call(
        kernel,
        out_shape=jax.ShapeDtypeStruct((t2, fp), jnp.float32),
        scratch_shapes=[pltpu.VMEM((n, 2 * cp), jnp.bfloat16)],
    )(a_bf, x_bf, inv_deg, w_all, s_all, sp, w_top, w_bot, fc_b)


# --------------------------- parameter handling ----------------------------- #

def init_params(key, in_channels, hidden_channels, out_channels, num_layers,
                sigmoid=True):
    """Raw parameters, shapes follow the torch module's __init__ (eval mode)."""
    params = {"layers": []}
    bn_eps = 1e-5
    dims = [in_channels] + [hidden_channels] * num_layers
    for li in range(num_layers):
        cin, cout = dims[li], dims[li + 1]
        key, k1, k2, k3 = jax.random.split(key, 4)
        bound = 1.0 / np.sqrt(cin)
        wl = jax.random.uniform(k1, (cin, cout), jnp.float32, -bound, bound)
        wr = jax.random.uniform(k2, (cin, cout), jnp.float32, -bound, bound)
        bl = jax.random.uniform(k3, (1, cout), jnp.float32, -bound, bound)
        if sigmoid:
            # BatchNorm1d after reset_parameters(): gamma=1, beta=0, rm=0, rv=1
            gamma = jnp.ones((1, cout), jnp.float32)
            beta = jnp.zeros((1, cout), jnp.float32)
            r_mean = jnp.zeros((1, cout), jnp.float32)
            r_var = jnp.ones((1, cout), jnp.float32)
            scale = gamma / jnp.sqrt(r_var + bn_eps)
            shift = beta - r_mean * scale
        else:
            scale = jnp.ones((1, cout), jnp.float32)   # BN not applied in forward
            shift = jnp.zeros((1, cout), jnp.float32)
        params["layers"].append((wl, wr, bl, scale, shift))
    key, k1, k2 = jax.random.split(key, 3)
    fin, fout = hidden_channels * 2, out_channels * 4
    bound = 1.0 / np.sqrt(fin)
    params["fc1_w"] = jax.random.uniform(k1, (fin, fout), jnp.float32, -bound, bound)
    params["fc1_b"] = jax.random.uniform(k2, (1, fout), jnp.float32, -bound, bound)
    return params


def prepare_fused_params(params):
    """One-time folding: BN scale into weight columns (then bf16), conv bias into
    the f32 shift, lin_l/lin_r merged into one [2*CP, CP] matrix, fc1 split into
    top/bottom halves, all lane dims zero-padded to multiples of 128 (exact)."""
    layers = params["layers"]
    max_c = max(max(wl.shape) for (wl, _, _, _, _) in layers)
    cp = _round_up(max_c)

    w_all, s_all = [], []
    for (wl, wr, b, scale, shift) in layers:
        cin, cout = wl.shape
        wl_f = wl * scale                         # fold BN scale into columns
        wr_f = wr * scale
        s_f = b * scale + shift                   # fold conv bias into shift
        w_pad = jnp.zeros((2 * cp, cp), jnp.float32)
        w_pad = w_pad.at[:cin, :cout].set(wl_f)           # rows for agg half
        w_pad = w_pad.at[cp:cp + cin, :cout].set(wr_f)    # rows for x half
        s_pad = jnp.zeros((1, cp), jnp.float32).at[:, :cout].set(s_f)
        w_all.append(w_pad)
        s_all.append(s_pad)
    w_all = jnp.stack(w_all).astype(jnp.bfloat16)  # [L, 2*CP, CP] bf16 MXU operand
    s_all = jnp.stack(s_all)                       # [L, 1, CP] f32 post-acc shift

    fc1_w, fc1_b = params["fc1_w"], params["fc1_b"]
    h = fc1_w.shape[0] // 2
    fout = fc1_w.shape[1]
    fp = _round_up(fout)
    w_top = (jnp.zeros((cp, fp), jnp.float32)
             .at[:h, :fout].set(fc1_w[:h]).astype(jnp.bfloat16))
    w_bot = (jnp.zeros((cp, fp), jnp.float32)
             .at[:h, :fout].set(fc1_w[h:]).astype(jnp.bfloat16))
    fc_b = jnp.zeros((1, fp), jnp.float32).at[:, :fout].set(fc1_b)
    return dict(w_all=w_all, s_all=s_all, w_top=w_top, w_bot=w_bot,
                fc_b=fc_b, cp=cp, fp=fp, fout=fout)


# ------------------------------ forward pass -------------------------------- #

def sage_forward(params, x, adj, cluster_index, train_idx, sigmoid=True):
    n, in_c = x.shape
    fused = prepare_fused_params(params)
    cp = fused["cp"]

    # graph structure precompute: keep exact integer counts for the bf16 MXU
    # matmul, keep the 1/deg normalization in f32 applied inside the kernel.
    deg = jnp.sum(adj, axis=1, keepdims=True)
    inv_deg = jnp.where(deg > 0, 1.0 / deg, 0.0).astype(jnp.float32)   # [N, 1]
    a_bf = adj.astype(jnp.bfloat16)                                    # exact counts

    t = train_idx.shape[0]
    c = cluster_index.shape[1]
    sel = jax.nn.one_hot(train_idx, n, dtype=jnp.float32)    # xt = sel @ x
    cnt = jnp.sum(cluster_index, axis=0)
    inv_cnt = jnp.where(cnt > 0, 1.0 / cnt, 0.0)             # guard empty clusters
    gat = jax.nn.one_hot(jnp.argmax(cluster_index, axis=-1), c, dtype=jnp.float32)
    # x1 = gat @ (diag(inv_cnt) @ cluster_index.T @ xt)  ==  p_mat @ x
    p_mat = (gat * inv_cnt[None, :]) @ cluster_index.T @ sel  # [T, N]
    # stacked gather matrix -> [xt; x1] from a single in-kernel matmul
    sp = jnp.concatenate([sel, p_mat], axis=0).astype(jnp.bfloat16)    # [2T, N]

    x_bf = (jnp.zeros((n, cp), jnp.float32)
            .at[:, :in_c].set(x).astype(jnp.bfloat16))

    out_p = sage_fused_call(a_bf, x_bf, inv_deg, fused["w_all"], fused["s_all"],
                            sp, fused["w_top"], fused["w_bot"], fused["fc_b"])
    out = out_p[:, :fused["fout"]]                           # strip lane padding
    if not sigmoid:
        out = jax.nn.log_softmax(out, axis=-1)
    return out


def sage_reference(params, x, adj, cluster_index, train_idx, sigmoid=True):
    """Pure-JAX f32 reference (mirrors the torch forward, eval mode)."""
    deg = jnp.sum(adj, axis=1, keepdims=True)
    inv_deg = jnp.where(deg > 0, 1.0 / deg, 0.0)
    for (wl, wr, b, scale, shift) in params["layers"]:
        agg = (adj @ x) * inv_deg
        h = agg @ wl + x @ wr + b
        x = jnp.maximum(h * scale + shift, 0.0)
    xt = x[train_idx]
    cf = (cluster_index.T @ xt) / jnp.sum(cluster_index, axis=0)[:, None]
    x1 = cf[jnp.argmax(cluster_index, axis=-1)]
    xcat = jnp.concatenate(
        [jnp.concatenate([xt, x1], 1), jnp.concatenate([x1, xt], 1)], 0)
    out = xcat @ params["fc1_w"] + params["fc1_b"]
    if not sigmoid:
        out = jax.nn.log_softmax(out, axis=-1)
    return out


# --------------------------------- main ------------------------------------- #

if __name__ == "__main__":
    # N padded to 128 so the aggregation matmul fills the MXU M/K dims.
    N, E = 128, 512                # nodes, edges
    IN_C, HID, OUT_C = 16, 32, 8   # in_channels, hidden_channels, out_channels
    NUM_LAYERS = 3
    T, C = 32, 4                   # num train nodes, num clusters
    SIGMOID = True

    key = jax.random.PRNGKey(0)
    key, kx, ke1, ke2 = jax.random.split(key, 4)

    x = jax.random.normal(kx, (N, IN_C), jnp.float32)
    src = jax.random.randint(ke1, (E,), 0, N)
    dst = jax.random.randint(ke2, (E,), 0, N)
    # densify: A[dst, src] += 1  (message count per target == scatter-mean denom)
    adj = jnp.zeros((N, N), jnp.float32).at[dst, src].add(1.0)

    # train_mask = first T nodes; one-hot cluster assignment of the train nodes
    train_idx = jnp.arange(T)
    assign = jnp.arange(T) % C
    cluster_index = jax.nn.one_hot(assign, C, dtype=jnp.float32)   # [T, C]

    params = init_params(jax.random.PRNGKey(42), IN_C, HID, OUT_C, NUM_LAYERS,
                         sigmoid=SIGMOID)

    out = sage_forward(params, x, adj, cluster_index, train_idx, sigmoid=SIGMOID)
    out = jax.block_until_ready(out)

    ref = sage_reference(params, x, adj, cluster_index, train_idx, sigmoid=SIGMOID)
    ref = jax.block_until_ready(ref)

    assert out.shape == (2 * T, OUT_C * 4), out.shape
    assert bool(jnp.all(jnp.isfinite(out)))
    # bf16 MXU operands with f32 accumulation: tolerance covers the cast error.
    np.testing.assert_allclose(np.asarray(out), np.asarray(ref), rtol=5e-2, atol=5e-2)

    print("KERNEL_OK")
</pallas_src>

<mosaic_0001>
module attributes {stable_mosaic.version = 11 : i64} {
  func.func @kernel(%arg0: memref<128x128xbf16, #tpu.memory_space<vmem>>, %arg1: memref<128x128xbf16, #tpu.memory_space<vmem>>, %arg2: memref<128x1xf32, #tpu.memory_space<vmem>>, %arg3: memref<3x256x128xbf16, #tpu.memory_space<vmem>>, %arg4: memref<3x1x128xf32, #tpu.memory_space<vmem>>, %arg5: memref<64x128xbf16, #tpu.memory_space<vmem>>, %arg6: memref<128x128xbf16, #tpu.memory_space<vmem>>, %arg7: memref<128x128xbf16, #tpu.memory_space<vmem>>, %arg8: memref<1x128xf32, #tpu.memory_space<vmem>>, %arg9: memref<64x128xf32, #tpu.memory_space<vmem>>, %arg10: memref<128x256xbf16, #tpu.memory_space<vmem>>) attributes {dimension_semantics = [], scalar_prefetch = 0 : i64, scratch_operands = 1 : i64, tpu.core_type = #tpu.core_type<tc>} {
    %c0 = arith.constant 0 : index
    %c0_0 = arith.constant 0 : index
    %0 = vector.load %arg0[%c0, %c0_0] : memref<128x128xbf16, #tpu.memory_space<vmem>>, vector<128x128xbf16>
    %c0_1 = arith.constant 0 : index
    %c0_2 = arith.constant 0 : index
    %1 = vector.load %arg2[%c0_1, %c0_2] : memref<128x1xf32, #tpu.memory_space<vmem>>, vector<128x1xf32>
    %c0_3 = arith.constant 0 : index
    %c0_4 = arith.constant 0 : index
    %2 = vector.load %arg1[%c0_3, %c0_4] : memref<128x128xbf16, #tpu.memory_space<vmem>>, vector<128x128xbf16>
    %c0_5 = arith.constant 0 : index
    %c128 = arith.constant 128 : index
    %3 = vector.load %arg10[%c0_5, %c128] : memref<128x256xbf16, #tpu.memory_space<vmem>>, vector<128x128xbf16>
    tpu.vector_store %arg10[%c0_5, %c128], %2 {strides = array<i32>} : memref<128x256xbf16, #tpu.memory_space<vmem>>, vector<128x128xbf16>,
    %c0_6 = arith.constant 0 : index
    %c128_7 = arith.constant 128 : index
    %4 = vector.load %arg10[%c0_6, %c128_7] : memref<128x256xbf16, #tpu.memory_space<vmem>>, vector<128x128xbf16>
    %cst = arith.constant dense<0.000000e+00> : vector<128x128xf32>
    %5 = tpu.matmul %0, %4, %cst {dimension_numbers = #tpu.dot_dimension_numbers<[1], [0], [0], [1], [0, 0, 1, 1], [], []>} : vector<128x128xbf16>, vector<128x128xbf16>, vector<128x128xf32> -> vector<128x128xf32>
    %6 = vector.broadcast %1 : vector<128x1xf32> to vector<128x128xf32>
    %7 = arith.mulf %5, %6 : vector<128x128xf32>
    %8 = arith.truncf %7 : vector<128x128xf32> to vector<128x128xbf16>
    %c0_8 = arith.constant 0 : index
    %c0_9 = arith.constant 0 : index
    %9 = vector.load %arg10[%c0_8, %c0_9] : memref<128x256xbf16, #tpu.memory_space<vmem>>, vector<128x128xbf16>
    tpu.vector_store %arg10[%c0_8, %c0_9], %8 {strides = array<i32>} : memref<128x256xbf16, #tpu.memory_space<vmem>>, vector<128x128xbf16>,
    %c0_10 = arith.constant 0 : index
    %c0_11 = arith.constant 0 : index
    %10 = vector.load %arg10[%c0_10, %c0_11] : memref<128x256xbf16, #tpu.memory_space<vmem>>, vector<128x256xbf16>
    %c0_12 = arith.constant 0 : index
    %c0_13 = arith.constant 0 : index
    %c0_14 = arith.constant 0 : index
    %11 = vector.load %arg3[%c0_12, %c0_13, %c0_14] : memref<3x256x128xbf16, #tpu.memory_space<vmem>>, vector<1x256x128xbf16>
    %12 = vector.shape_cast %11 : vector<1x256x128xbf16> to vector<256x128xbf16>
    %cst_15 = arith.constant dense<0.000000e+00> : vector<128x128xf32>
    %13 = tpu.matmul %10, %12, %cst_15 {dimension_numbers = #tpu.dot_dimension_numbers<[1], [0], [0], [1], [0, 0, 1, 1], [], []>} : vector<128x256xbf16>, vector<256x128xbf16>, vector<128x128xf32> -> vector<128x128xf32>
    %c0_16 = arith.constant 0 : index
    %c0_17 = arith.constant 0 : index
    %c0_18 = arith.constant 0 : index
    %14 = vector.load %arg4[%c0_16, %c0_17, %c0_18] : memref<3x1x128xf32, #tpu.memory_space<vmem>>, vector<1x1x128xf32>
    %15 = vector.shape_cast %14 : vector<1x1x128xf32> to vector<1x128xf32>
    %16 = vector.broadcast %15 : vector<1x128xf32> to vector<128x128xf32>
    %17 = arith.addf %13, %16 : vector<128x128xf32>
    %cst_19 = arith.constant 0.000000e+00 : f32
    %18 = vector.broadcast %cst_19 : f32 to vector<128x128xf32>
    %19 = arith.maximumf %17, %18 : vector<128x128xf32>
    %20 = arith.truncf %19 : vector<128x128xf32> to vector<128x128xbf16>
    %c0_20 = arith.constant 0 : index
    %c128_21 = arith.constant 128 : index
    %21 = vector.load %arg10[%c0_20, %c128_21] : memref<128x256xbf16, #tpu.memory_space<vmem>>, vector<128x128xbf16>
    tpu.vector_store %arg10[%c0_20, %c128_21], %20 {strides = array<i32>} : memref<128x256xbf16, #tpu.memory_space<vmem>>, vector<128x128xbf16>,
    %c0_22 = arith.constant 0 : index
    %c128_23 = arith.constant 128 : index
    %22 = vector.load %arg10[%c0_22, %c128_23] : memref<128x256xbf16, #tpu.memory_space<vmem>>, vector<128x128xbf16>
    %cst_24 = arith.constant dense<0.000000e+00> : vector<128x128xf32>
    %23 = tpu.matmul %0, %22, %cst_24 {dimension_numbers = #tpu.dot_dimension_numbers<[1], [0], [0], [1], [0, 0, 1, 1], [], []>} : vector<128x128xbf16>, vector<128x128xbf16>, vector<128x128xf32> -> vector<128x128xf32>
    %24 = vector.broadcast %1 : vector<128x1xf32> to vector<128x128xf32>
    %25 = arith.mulf %23, %24 : vector<128x128xf32>
    %26 = arith.truncf %25 : vector<128x128xf32> to vector<128x128xbf16>
    %c0_25 = arith.constant 0 : index
    %c0_26 = arith.constant 0 : index
    %27 = vector.load %arg10[%c0_25, %c0_26] : memref<128x256xbf16, #tpu.memory_space<vmem>>, vector<128x128xbf16>
    tpu.vector_store %arg10[%c0_25, %c0_26], %26 {strides = array<i32>} : memref<128x256xbf16, #tpu.memory_space<vmem>>, vector<128x128xbf16>,
    %c0_27 = arith.constant 0 : index
    %c0_28 = arith.constant 0 : index
    %28 = vector.load %arg10[%c0_27, %c0_28] : memref<128x256xbf16, #tpu.memory_space<vmem>>, vector<128x256xbf16>
    %c1 = arith.constant 1 : index
    %c0_29 = arith.constant 0 : index
    %c0_30 = arith.constant 0 : index
    %29 = vector.load %arg3[%c1, %c0_29, %c0_30] : memref<3x256x128xbf16, #tpu.memory_space<vmem>>, vector<1x256x128xbf16>
    %30 = vector.shape_cast %29 : vector<1x256x128xbf16> to vector<256x128xbf16>
    %cst_31 = arith.constant dense<0.000000e+00> : vector<128x128xf32>
    %31 = tpu.matmul %28, %30, %cst_31 {dimension_numbers = #tpu.dot_dimension_numbers<[1], [0], [0], [1], [0, 0, 1, 1], [], []>} : vector<128x256xbf16>, vector<256x128xbf16>, vector<128x128xf32> -> vector<128x128xf32>
    %c1_32 = arith.constant 1 : index
    %c0_33 = arith.constant 0 : index
    %c0_34 = arith.constant 0 : index
    %32 = vector.load %arg4[%c1_32, %c0_33, %c0_34] : memref<3x1x128xf32, #tpu.memory_space<vmem>>, vector<1x1x128xf32>
    %33 = vector.shape_cast %32 : vector<1x1x128xf32> to vector<1x128xf32>
    %34 = vector.broadcast %33 : vector<1x128xf32> to vector<128x128xf32>
    %35 = arith.addf %31, %34 : vector<128x128xf32>
    %cst_35 = arith.constant 0.000000e+00 : f32
    %36 = vector.broadcast %cst_35 : f32 to vector<128x128xf32>
    %37 = arith.maximumf %35, %36 : vector<128x128xf32>
    %38 = arith.truncf %37 : vector<128x128xf32> to vector<128x128xbf16>
    %c0_36 = arith.constant 0 : index
    %c128_37 = arith.constant 128 : index
    %39 = vector.load %arg10[%c0_36, %c128_37] : memref<128x256xbf16, #tpu.memory_space<vmem>>, vector<128x128xbf16>
    tpu.vector_store %arg10[%c0_36, %c128_37], %38 {strides = array<i32>} : memref<128x256xbf16, #tpu.memory_space<vmem>>, vector<128x128xbf16>,
    %c0_38 = arith.constant 0 : index
    %c128_39 = arith.constant 128 : index
    %40 = vector.load %arg10[%c0_38, %c128_39] : memref<128x256xbf16, #tpu.memory_space<vmem>>, vector<128x128xbf16>
    %cst_40 = arith.constant dense<0.000000e+00> : vector<128x128xf32>
    %41 = tpu.matmul %0, %40, %cst_40 {dimension_numbers = #tpu.dot_dimension_numbers<[1], [0], [0], [1], [0, 0, 1, 1], [], []>} : vector<128x128xbf16>, vector<128x128xbf16>, vector<128x128xf32> -> vector<128x128xf32>
    %42 = vector.broadcast %1 : vector<128x1xf32> to vector<128x128xf32>
    %43 = arith.mulf %41, %42 : vector<128x128xf32>
    %44 = arith.truncf %43 : vector<128x128xf32> to vector<128x128xbf16>
    %c0_41 = arith.constant 0 : index
    %c0_42 = arith.constant 0 : index
    %45 = vector.load %arg10[%c0_41, %c0_42] : memref<128x256xbf16, #tpu.memory_space<vmem>>, vector<128x128xbf16>
    tpu.vector_store %arg10[%c0_41, %c0_42], %44 {strides = array<i32>} : memref<128x256xbf16, #tpu.memory_space<vmem>>, vector<128x128xbf16>,
    %c0_43 = arith.constant 0 : index
    %c0_44 = arith.constant 0 : index
    %46 = vector.load %arg10[%c0_43, %c0_44] : memref<128x256xbf16, #tpu.memory_space<vmem>>, vector<128x256xbf16>
    %c2 = arith.constant 2 : index
    %c0_45 = arith.constant 0 : index
    %c0_46 = arith.constant 0 : index
    %47 = vector.load %arg3[%c2, %c0_45, %c0_46] : memref<3x256x128xbf16, #tpu.memory_space<vmem>>, vector<1x256x128xbf16>
    %48 = vector.shape_cast %47 : vector<1x256x128xbf16> to vector<256x128xbf16>
    %cst_47 = arith.constant dense<0.000000e+00> : vector<128x128xf32>
    %49 = tpu.matmul %46, %48, %cst_47 {dimension_numbers = #tpu.dot_dimension_numbers<[1], [0], [0], [1], [0, 0, 1, 1], [], []>} : vector<128x256xbf16>, vector<256x128xbf16>, vector<128x128xf32> -> vector<128x128xf32>
    %c2_48 = arith.constant 2 : index
    %c0_49 = arith.constant 0 : index
    %c0_50 = arith.constant 0 : index
    %50 = vector.load %arg4[%c2_48, %c0_49, %c0_50] : memref<3x1x128xf32, #tpu.memory_space<vmem>>, vector<1x1x128xf32>
    %51 = vector.shape_cast %50 : vector<1x1x128xf32> to vector<1x128xf32>
    %52 = vector.broadcast %51 : vector<1x128xf32> to vector<128x128xf32>
    %53 = arith.addf %49, %52 : vector<128x128xf32>
    %cst_51 = arith.constant 0.000000e+00 : f32
    %54 = vector.broadcast %cst_51 : f32 to vector<128x128xf32>
    %55 = arith.maximumf %53, %54 : vector<128x128xf32>
    %56 = arith.truncf %55 : vector<128x128xf32> to vector<128x128xbf16>
    %c0_52 = arith.constant 0 : index
    %c128_53 = arith.constant 128 : index
    %57 = vector.load %arg10[%c0_52, %c128_53] : memref<128x256xbf16, #tpu.memory_space<vmem>>, vector<128x128xbf16>
    tpu.vector_store %arg10[%c0_52, %c128_53], %56 {strides = array<i32>} : memref<128x256xbf16, #tpu.memory_space<vmem>>, vector<128x128xbf16>,
    %c0_54 = arith.constant 0 : index
    %c128_55 = arith.constant 128 : index
    %58 = vector.load %arg10[%c0_54, %c128_55] : memref<128x256xbf16, #tpu.memory_space<vmem>>, vector<128x128xbf16>
    %c0_56 = arith.constant 0 : index
    %c0_57 = arith.constant 0 : index
    %59 = vector.load %arg5[%c0_56, %c0_57] : memref<64x128xbf16, #tpu.memory_space<vmem>>, vector<64x128xbf16>
    %cst_58 = arith.constant dense<0.000000e+00> : vector<64x128xf32>
    %60 = tpu.matmul %59, %58, %cst_58 {dimension_numbers = #tpu.dot_dimension_numbers<[1], [0], [0], [1], [0, 0, 1, 1], [], []>} : vector<64x128xbf16>, vector<128x128xbf16>, vector<64x128xf32> -> vector<64x128xf32>
    %61 = arith.truncf %60 : vector<64x128xf32> to vector<64x128xbf16>
    %c32_i32 = arith.constant 32 : i32
    %62 = tpu.dynamic_rotate %60 by %c32_i32 dim 0 : vector<64x128xf32>, i32 -> vector<64x128xf32>
    %63 = arith.truncf %62 : vector<64x128xf32> to vector<64x128xbf16>
    %c0_59 = arith.constant 0 : index
    %c0_60 = arith.constant 0 : index
    %64 = vector.load %arg6[%c0_59, %c0_60] : memref<128x128xbf16, #tpu.memory_space<vmem>>, vector<128x128xbf16>
    %cst_61 = arith.constant dense<0.000000e+00> : vector<64x128xf32>
    %65 = tpu.matmul %61, %64, %cst_61 {dimension_numbers = #tpu.dot_dimension_numbers<[1], [0], [0], [1], [0, 0, 1, 1], [], []>} : vector<64x128xbf16>, vector<128x128xbf16>, vector<64x128xf32> -> vector<64x128xf32>
    %c0_62 = arith.constant 0 : index
    %c0_63 = arith.constant 0 : index
    %66 = vector.load %arg7[%c0_62, %c0_63] : memref<128x128xbf16, #tpu.memory_space<vmem>>, vector<128x128xbf16>
    %cst_64 = arith.constant dense<0.000000e+00> : vector<64x128xf32>
    %67 = tpu.matmul %63, %66, %cst_64 {dimension_numbers = #tpu.dot_dimension_numbers<[1], [0], [0], [1], [0, 0, 1, 1], [], []>} : vector<64x128xbf16>, vector<128x128xbf16>, vector<64x128xf32> -> vector<64x128xf32>
    %68 = arith.addf %65, %67 : vector<64x128xf32>
    %c0_65 = arith.constant 0 : index
    %c0_66 = arith.constant 0 : index
    %69 = vector.load %arg8[%c0_65, %c0_66] : memref<1x128xf32, #tpu.memory_space<vmem>>, vector<1x128xf32>
    %70 = vector.broadcast %69 : vector<1x128xf32> to vector<64x128xf32>
    %71 = arith.addf %68, %70 : vector<64x128xf32>
    %c0_67 = arith.constant 0 : index
    %c0_68 = arith.constant 0 : index
    %72 = vector.load %arg9[%c0_67, %c0_68] : memref<64x128xf32, #tpu.memory_space<vmem>>, vector<64x128xf32>
    tpu.vector_store %arg9[%c0_67, %c0_68], %71 {strides = array<i32>} : memref<64x128xf32, #tpu.memory_space<vmem>>, vector<64x128xf32>,
    return
  }
}

</mosaic_0001>

<bundles_post_ra>
// kernel: tpu_custom_call.1
= control target key start
LH: loop header
LB: loop body
LE: loop exit
PB: predicated region body
PF: predicated region fallthrough
CT: control target
= control target key end

     0   :  { %14 = vsyncpa [#allocation4], 0  ;;  %s3296_s0 = inlined_call_operand.vmem [shape: bf16[128,128], index: 0, kind: input, shape index: {}]   ;;  %s3297_s1 = inlined_call_operand.vmem [shape: bf16[128,128], index: 1, kind: input, shape index: {}]   ;;  %s3298_s2 = inlined_call_operand.vmem [shape: f32[128,1], index: 2, kind: input, shape index: {}]   ;;  %s3299_s3 = inlined_call_operand.hbm [shape: bf16[3,256,128], index: 3, kind: input, shape index: {}]   ;;  %s3300_s4 = inlined_call_operand.vmem [shape: f32[3,1,128], index: 4, kind: input, shape index: {}]   ;;  %s3301_s5 = inlined_call_operand.hbm [shape: bf16[64,128], index: 5, kind: input, shape index: {}]   ;;  %s3302_s6 = inlined_call_operand.hbm [shape: bf16[128,128], index: 6, kind: input, shape index: {}]   ;;  %s3303_s7 = inlined_call_operand.hbm [shape: bf16[128,128], index: 7, kind: input, shape index: {}]   ;;  %s3304_s8 = inlined_call_operand.vmem [shape: f32[1,128], index: 8, kind: input, shape index: {}]   ;;  %s3305_s9 = inlined_call_operand.hbm [shape: f32[64,128], index: 9, kind: output, shape index: {}]  }
   0x1   :  { %15 = vsyncpa [#allocation7], 0 }
   0x2   :  { %16 = vsyncpa [#allocation10], 0 }
   0x3   :  { %17 = vsyncpa [#allocation5], 0  ;;  %s2745_s30 = smov [#allocation6]   ;;  %s2746_s11 = smov [#allocation3]  }
   0x4   :  { %s43_s10 = sshll.u32 %s2745_s30, 4  ;;  %s29_s12 = sshll.u32 %s2746_s11, 4  ;;  %s44_s10 = int_to_ptr.vmem [resolvable:$true] %s43_s10  ;;  %s2805_s12 = int_to_ptr.vmem [resolvable:$true] %s29_s12 }
   0x5   :  { %s2627_s15 = scalar_lea.hbm %s3301_s5, 512 }
   0x6   :  { %p2628_p0 = scmp.ne.s32.totalorder %s3301_s5, %s2627_s15  ;;  %p2631_p1 = scmp.lt.u32.totalorder %s2627_s15, %s3301_s5 }
   0x8   :  { %p2633_p2 = pnand %p2631_p1, %p2628_p0 }
   0xa   :  { %2636 = shalt.err (!%p2633_p2)
}
   0xb   :  { %s2637_s20 = scalar_lea.vmem %s44_s10, 512  ;;  %p2642_p4 = scmp.lt.s32.totalorder %s44_s10, %s44_s10 }
   0xc   :  { %p2638_p3 = scmp.ne.s32.totalorder %s44_s10, %s2637_s20  ;;  %p2643_p5 = scmp.lt.s32.totalorder %s2637_s20, %s2637_s20 }
   0xe   :  { %p2644_p6 = por %p2643_p5, %p2642_p4 }
  0x10   :  { %p2645_p7 = pnand %p2644_p6, %p2638_p3 }
  0x12   :  { %2648 = shalt.err (!%p2645_p7)
}
  0x13   :  { %s2747_s21 = smov 64   ;;  %s2748_s22 = smov 4  }
  0x14   :  { %49 = dma.hbm_to_vmem [thread:$0]  %s3301_s5, 512, %s44_s10, [#allocation7], %s2747_s21, %s2747_s21, %s2748_s22  }
  0x15   :  { %s2649_s27 = scalar_lea.hbm %s3299_s3, 6144 }
  0x16   :  { %p2650_p8 = scmp.ne.s32.totalorder %s3299_s3, %s2649_s27  ;;  %p2653_p9 = scmp.lt.u32.totalorder %s2649_s27, %s3299_s3 }
  0x18   :  { %p2655_p10 = pnand %p2653_p9, %p2650_p8 }
  0x1a   :  { %2658 = shalt.err (!%p2655_p10)
}
  0x1b   :  { %s2659_s13 = scalar_lea.vmem %s2805_s12, 6144  ;;  %p2664_p12 = scmp.lt.s32.totalorder %s2805_s12, %s2805_s12 }
  0x1c   :  { %p2660_p11 = scmp.ne.s32.totalorder %s2805_s12, %s2659_s13  ;;  %p2665_p13 = scmp.lt.s32.totalorder %s2659_s13, %s2659_s13 }
  0x1e   :  { %p2666_p0 = por %p2665_p13, %p2664_p12 }
  0x20   :  { %p2667_p1 = pnand %p2666_p0, %p2660_p11 }
  0x22   :  { %2670 = shalt.err (!%p2667_p1)
}
  0x23   :  { %35 = dma.hbm_to_vmem [thread:$0]  %s3299_s3, 6144, %s2805_s12, [#allocation4], %s2747_s21, %s2747_s21, %s2748_s22  }
  0x24   :  { %s2749_s14 = smov [#allocation8]   ;;  %s2750_s16 = smov [#allocation9]  }
  0x25   :  { %s55_s15 = sshll.u32 %s2749_s14, 4  ;;  %s67_s17 = sshll.u32 %s2750_s16, 4  ;;  %s56_s15 = int_to_ptr.vmem [resolvable:$true] %s55_s15  ;;  %s2842_s17 = int_to_ptr.vmem [resolvable:$true] %s67_s17 }
  0x26   :  { %s2671_s20 = scalar_lea.hbm %s3302_s6, 1024 }
  0x27   :  { %p2672_p2 = scmp.ne.s32.totalorder %s3302_s6, %s2671_s20  ;;  %p2675_p3 = scmp.lt.u32.totalorder %s2671_s20, %s3302_s6 }
  0x29   :  { %p2677_p4 = pnand %p2675_p3, %p2672_p2 }
  0x2b   :  { %2680 = shalt.err (!%p2677_p4)
}
  0x2c   :  { %s2681_s3 = scalar_lea.vmem %s56_s15, 1024  ;;  %p2686_p6 = scmp.lt.s32.totalorder %s56_s15, %s56_s15 }
  0x2d   :  { %p2682_p5 = scmp.ne.s32.totalorder %s56_s15, %s2681_s3  ;;  %p2687_p7 = scmp.lt.s32.totalorder %s2681_s3, %s2681_s3 }
  0x2f   :  { %p2688_p8 = por %p2687_p7, %p2686_p6 }
  0x31   :  { %p2689_p9 = pnand %p2688_p8, %p2682_p5 }
  0x33   :  { %2692 = shalt.err (!%p2689_p9)
}
  0x34   :  { %61 = dma.hbm_to_vmem [thread:$0]  %s3302_s6, 1024, %s56_s15, [#allocation7], %s2747_s21, %s2747_s21, %s2748_s22  }
  0x35   :  { %s2693_s30 = scalar_lea.hbm %s3303_s7, 1024 }
  0x36   :  { %p2694_p10 = scmp.ne.s32.totalorder %s3303_s7, %s2693_s30  ;;  %p2697_p11 = scmp.lt.u32.totalorder %s2693_s30, %s3303_s7 }
  0x38   :  { %p2699_p12 = pnand %p2697_p11, %p2694_p10 }
  0x3a   :  { %2702 = shalt.err (!%p2699_p12)
}
  0x3b   :  { %s2703_s14 = scalar_lea.vmem %s2842_s17, 1024  ;;  %p2708_p0 = scmp.lt.s32.totalorder %s2842_s17, %s2842_s17 }
  0x3c   :  { %p2704_p13 = scmp.ne.s32.totalorder %s2842_s17, %s2703_s14  ;;  %p2709_p1 = scmp.lt.s32.totalorder %s2703_s14, %s2703_s14 }
  0x3e   :  { %p2710_p2 = por %p2709_p1, %p2708_p0 }
  0x40   :  { %p2711_p3 = pnand %p2710_p2, %p2704_p13 }
  0x42   :  { %2714 = shalt.err (!%p2711_p3)
}
  0x43   :  { %73 = dma.hbm_to_vmem [thread:$0]  %s3303_s7, 1024, %s2842_s17, [#allocation10], %s2747_s21, %s2747_s21, %s2748_s22  }
  0x44   :  { %2737 = dma.done.wait [#allocation4], 6144  }
  0x45   :  { %2738 = vsyncadd [#allocation4], 4294961152 }
  0x46   :  { %2739 = dma.done.wait [#allocation7], 1536  }
  0x47   :  { %2740 = vsyncadd [#allocation7], 4294965760 }
  0x48   :  { %2741 = dma.done.wait [#allocation10], 1024  }
  0x49   :  { %2742 = vsyncadd [#allocation10], 4294966272  ;;  %v2751_v0 = vmov 0   ;;  %v2539_v1 = vld [vmem:[%s3297_s1] sm:$0xff]   ;;  %v2885_v2 = vld [vmem:[%s3297_s1 + $0x8] sm:$0xff]   ;;  %s2752_s16 = smov [#allocation11]  }
  0x4a   :  { %2537 = vset.pattern.permute.xlu0 %v2751_v0  ;;  %2538 = vset.pattern.permute.xlu1 %v2751_v0  ;;  %v2891_v3 = vld [vmem:[%s3297_s1 + $0x10] sm:$0xff]   ;;  %v2897_v4 = vld [vmem:[%s3297_s1 + $0x18] sm:$0xff]   ;;  %v2903_v5 = vld [vmem:[%s3296_s0] sm:$0xff]   ;;  %s1971_s18 = sshll.u32 %s2752_s16, 4  ;;  %s1972_s18 = int_to_ptr.vmem [resolvable:$true] %s1971_s18 }
  0x4b   :  { %2351 = vmatprep.subr.bf16.mxu0 %v2539_v1  ;;  %641 = vmatprep.mubr.bf16.mxu1 %v2539_v1  ;;  %v2911_v6 = vld [vmem:[%s3297_s1 + $0x20] sm:$0xff]   ;;  %v2918_v7 = vld [vmem:[%s3297_s1 + $0x28] sm:$0xff]   ;;  %v107_v9 = vld [vmem:[%s3298_s2 + $0x10] sm:$0xff]  ;;  %p2720_p5 = scmp.lt.s32.totalorder %s1972_s18, %s1972_s18 }
  0x4c   :  { %2352 = vmatpush3.bf16.msra.mxu0 %v2539_v1  ;;  %2367 = vmatprep.mubr.bf16.mxu0 %v2903_v5  ;;  %v105_v8 = vld [vmem:[%s3298_s2] sm:$0xff]  ;;  %v106_v10 = vld [vmem:[%s3298_s2 + $0x8] sm:$0xff]  ;;  %v108_v11 = vld [vmem:[%s3298_s2 + $0x18] sm:$0xff] }
  0x4d   :  { %2353 = vmatprep.subr.bf16.mxu0 %v2885_v2  ;;  %348 = vperm.xlu0 %2537, %v105_v8   ;;  %v2937_v12 = vld [vmem:[%s3297_s1 + $0x30] sm:$0xff]   ;;  %v109_v13 = vld [vmem:[%s3298_s2 + $0x20] sm:$0xff]  ;;  %v110_v14 = vld [vmem:[%s3298_s2 + $0x28] sm:$0xff] }
  0x4e   :  { %358 = vperm.xlu1 %2538, %v107_v9   ;;  %v2948_v15 = vld [vmem:[%s3297_s1 + $0x38] sm:$0xff]   ;;  %v2555_v16 = vld [vmem:[#allocation3 + $0x40] sm:$0xff]   ;;  %v111_v18 = vld [vmem:[%s3298_s2 + $0x30] sm:$0xff] }
  0x4f   :  { %v2556_v17 = vld [vmem:[#allocation3] sm:$0xff]   ;;  %v112_v19 = vld [vmem:[%s3298_s2 + $0x38] sm:$0xff]  ;;  %2091 = vmatprep.subr.bf16.mxu1 %v2555_v16  ;;  %v2557_v20 = vld [vmem:[#allocation3 + $0x48] sm:$0xff]  }
  0x50   :  { %2354 = vmatpush3.bf16.msra.mxu0 %v2885_v2  ;;  %v2558_v21 = vld [vmem:[#allocation3 + $0x8] sm:$0xff]   ;;  %2092 = vmatpush3.bf16.msra.mxu1 %v2556_v17  ;;  %v113_v23 = vld [vmem:[%s3298_s2 + $0x40] sm:$0xff]  ;;  %v2559_v25 = vld [vmem:[#allocation3 + $0x50] sm:$0xff]  }
  0x51   :  { %2355 = vmatprep.subr.bf16.mxu0 %v2891_v3  ;;  %353 = vperm.xlu0 %2537, %v106_v10   ;;  %v2963_v22 = vld [vmem:[%s3296_s0 + $0x8] sm:$0xff]   ;;  %v2560_v26 = vld [vmem:[#allocation3 + $0x10] sm:$0xff]   ;;  %v116_v29 = vld [vmem:[%s3298_s2 + $0x58] sm:$0xff] }
  0x52   :  { %363 = vperm.xlu1 %2538, %v108_v11   ;;  %2093 = vmatprep.subr.bf16.mxu1 %v2557_v20  ;;  %v114_v24 = vld [vmem:[%s3298_s2 + $0x48] sm:$0xff]  ;;  %v2974_v27 = vld [vmem:[%s3296_s0 + $0x10] sm:$0xff]   ;;  %v2561_v30 = vld [vmem:[#allocation3 + $0x58] sm:$0xff]  }
  0x53   :  { %v115_v28 = vld [vmem:[%s3298_s2 + $0x50] sm:$0xff]  ;;  %v2562_v31 = vld [vmem:[#allocation3 + $0x18] sm:$0xff]   ;;  %v117_v33 = vld [vmem:[%s3298_s2 + $0x60] sm:$0xff] }
  0x54   :  { %2356 = vmatpush3.bf16.msra.mxu0 %v2891_v3  ;;  %2094 = vmatpush3.bf16.msra.mxu1 %v2558_v21  ;;  %v2988_v32 = vld [vmem:[%s3296_s0 + $0x18] sm:$0xff]   ;;  %v118_v34 = vld [vmem:[%s3298_s2 + $0x68] sm:$0xff]  ;;  %v2563_v35 = vld [vmem:[#allocation3 + $0x60] sm:$0xff]  }
  0x55   :  { %2357 = vmatprep.subr.bf16.mxu0 %v2897_v4  ;;  %368 = vperm.xlu0 %2537, %v109_v13   ;;  %v2564_v36 = vld [vmem:[#allocation3 + $0x20] sm:$0xff]   ;;  %v119_v38 = vld [vmem:[%s3298_s2 + $0x70] sm:$0xff]  ;;  %v120_v39 = vld [vmem:[%s3298_s2 + $0x78] sm:$0xff] }
  0x56   :  { %373 = vperm.xlu1 %2538, %v110_v14   ;;  %2095 = vmatprep.subr.bf16.mxu1 %v2559_v25  ;;  %v2999_v37 = vld [vmem:[%s3296_s0 + $0x20] sm:$0xff]   ;;  %v2565_v40 = vld [vmem:[#allocation3 + $0x68] sm:$0xff]   ;;  %v3017_v43 = vld [vmem:[%s3296_s0 + $0x30] sm:$0xff]  }
  0x57   :  { %v2566_v41 = vld [vmem:[#allocation3 + $0x28] sm:$0xff]   ;;  %v3024_v44 = vld [vmem:[%s3296_s0 + $0x38] sm:$0xff]   ;;  %v2567_v45 = vld [vmem:[#allocation3 + $0x70] sm:$0xff]  }
  0x58   :  { %2358 = vmatpush3.bf16.msra.mxu0 %v2897_v4  ;;  %2096 = vmatpush3.bf16.msra.mxu1 %v2560_v26  ;;  %v3012_v42 = vld [vmem:[%s3296_s0 + $0x28] sm:$0xff]   ;;  %v2568_v46 = vld [vmem:[#allocation3 + $0x30] sm:$0xff]   ;;  %v2569_v47 = vld [vmem:[#allocation3 + $0x78] sm:$0xff]  }
  0x59   :  { %2359 = vmatprep.subr.bf16.mxu0 %v2911_v6  ;;  %378 = vperm.xlu0 %2537, %v111_v18   ;;  %v2570_v48 = vld [vmem:[#allocation3 + $0x38] sm:$0xff]  }
  0x5a   :  { %383 = vperm.xlu1 %2538, %v112_v19   ;;  %2097 = vmatprep.subr.bf16.mxu1 %v2561_v30 }
  0x5c   :  { %2360 = vmatpush3.bf16.msra.mxu0 %v2911_v6  ;;  %2098 = vmatpush3.bf16.msra.mxu1 %v2562_v31 }
  0x5d   :  { %2361 = vmatprep.subr.bf16.mxu0 %v2918_v7  ;;  %388 = vperm.xlu0 %2537, %v113_v23  }
  0x5e   :  { %393 = vperm.xlu1 %2538, %v114_v24   ;;  %2099 = vmatprep.subr.bf16.mxu1 %v2563_v35 }
  0x60   :  { %2362 = vmatpush3.bf16.msra.mxu0 %v2918_v7  ;;  %2100 = vmatpush3.bf16.msra.mxu1 %v2564_v36 }
  0x61   :  { %2363 = vmatprep.subr.bf16.mxu0 %v2937_v12  ;;  %398 = vperm.xlu0 %2537, %v115_v28  }
  0x62   :  { %403 = vperm.xlu1 %2538, %v116_v29   ;;  %2101 = vmatprep.subr.bf16.mxu1 %v2565_v40 }
  0x64   :  { %2364 = vmatpush3.bf16.msra.mxu0 %v2937_v12  ;;  %2102 = vmatpush3.bf16.msra.mxu1 %v2566_v41 }
  0x65   :  { %2365 = vmatprep.subr.bf16.mxu0 %v2948_v15  ;;  %408 = vperm.xlu0 %2537, %v117_v33  }
  0x66   :  { %413 = vperm.xlu1 %2538, %v118_v34   ;;  %2103 = vmatprep.subr.bf16.mxu1 %v2567_v45 }
  0x68   :  { %2366 = vmatpush3.bf16.msra.mxu0 %v2948_v15  ;;  %2104 = vmatpush3.bf16.msra.mxu1 %v2568_v46 }
  0x69   :  { %418 = vperm.xlu0 %2537, %v119_v38   ;;  %2105 = vmatprep.subr.bf16.mxu1 %v2569_v47 }
  0x6a   :  { %423 = vperm.xlu1 %2538, %v120_v39  }
  0x6b   :  { %2368 = vmatmul.mubr.bf16.vlgmr.msra.gmra.mrb[0].mxu0 %v2963_v22 }
  0x6c   :  { %2371 = vmatprep.mubr.bf16.mxu0 %v2974_v27  ;;  %2106 = vmatpush3.bf16.msra.mxu1 %v2570_v48 }
  0x73   :  { %2372 = vmatmul.mubr.bf16.gmra.mrb[4].mxu0 %v2988_v32 }
  0x74   :  { %2375 = vmatprep.mubr.bf16.mxu0 %v2999_v37 }
  0x7b   :  { %2376 = vmatmul.mubr.bf16.gmra.mrb[8].mxu0 %v3012_v42 }
  0x7c   :  { %2379 = vmatprep.mubr.bf16.mxu0 %v3017_v43 }
  0x83   :  { %2380 = vmatmul.mubr.bf16.gmra.mrb[12].mxu0 %v3024_v44 }
  0x84   :  { %2399 = vmatprep.mubr.bf16.mxu0 %v2903_v5 }
  0xcc   :  { %v3028_v49 = vpop.permute.xlu0 %348 }
  0xcd   :  { %v3030_v50 = vpop.permute.xlu1 %358 }
  0xd0   :  { %v3032_v51 = vpop.permute.xlu0 %353 }
  0xd1   :  { %v3034_v52 = vpop.permute.xlu1 %363 }
  0xd4   :  { %v3036_v53 = vpop.permute.xlu0 %368 }
  0xd5   :  { %v3038_v54 = vpop.permute.xlu1 %373 }
  0xd8   :  { %v3040_v56 = vpop.permute.xlu0 %378 }
  0xd9   :  { %v3042_v58 = vpop.permute.xlu1 %383 }
  0xdc   :  { %v3048_v9 = vpop.permute.xlu0 %388 }
  0xdd   :  { %v3050_v10 = vpop.permute.xlu1 %393 }
  0xe0   :  { %v3057_v21 = vpop.permute.xlu0 %398 }
  0xe1   :  { %v3059_v24 = vpop.permute.xlu1 %403 }
  0xe4   :  { %v3062_v29 = vpop.permute.xlu0 %408 }
  0xe5   :  { %v3066_v34 = vpop.permute.xlu1 %413 }
  0xe8   :  { %v3070_v41 = vpop.permute.xlu0 %418 }
  0xe9   :  { %v3073_v45 = vpop.permute.xlu1 %423 }
 0x13e   :  { %v2369_v55 = vpop.f32.mrb[0].mxu0 }
 0x13f   :  { %v283_v57 = vpop.f32.mrb[1].mxu0  ;;  %v428_v60 = vmul.f32 %v2369_v55, %v3030_v50 }
 0x140   :  { %v2370_v59 = vpop.f32.mrb[2].mxu0  ;;  %v426_v63 = vmul.f32 %v3028_v49, %v283_v57 }
 0x141   :  { %v429_v61 = vmul.f32 %v2370_v59, %v3034_v52  ;;  %v286_v62 = vpop.f32.mrb[3].mxu0 }
 0x142   :  { %v427_v0 = vmul.f32 %v3032_v51, %v286_v62  ;;  %v3087_v62 = vld [vmem:[%s3300_s4] ss:$0 sm:$0xff] }
 0x143   :  { %v443_v1 = vpack.c.bf16 %v429_v61, %v428_v60 }
 0x144   :  { %v442_v8 = vpack.c.bf16 %v427_v0, %v426_v63 }
 0x146   :  { %v2373_v11 = vpop.f32.mrb[4].mxu0  ;;  %642 = vmatmul.mubr.bf16.vlgmr.msra.gmra.mrb[0].mxu1 %v442_v8 }
 0x147   :  { %v299_v13 = vpop.f32.mrb[5].mxu0  ;;  %649 = vmatprep.mubr.bf16.mxu1 %v2885_v2  ;;  %v432_v16 = vmul.f32 %v2373_v11, %v3040_v56 }
 0x148   :  { %v2374_v14 = vpop.f32.mrb[6].mxu0  ;;  %v430_v19 = vmul.f32 %v3036_v53, %v299_v13 }
 0x149   :  { %v433_v17 = vmul.f32 %v2374_v14, %v3042_v58  ;;  %v302_v18 = vpop.f32.mrb[7].mxu0 }
 0x14a   :  { %v431_v20 = vmul.f32 %v3038_v54, %v302_v18 }
 0x14b   :  { %v445_v23 = vpack.c.bf16 %v433_v17, %v432_v16 }
 0x14c   :  { %v444_v25 = vpack.c.bf16 %v431_v20, %v430_v19 }
 0x14e   :  { %v2377_v26 = vpop.f32.mrb[8].mxu0  ;;  %650 = vmatmul.mubr.bf16.gmra.mrb[4].mxu1 %v443_v1 }
 0x14f   :  { %v315_v28 = vpop.f32.mrb[9].mxu0  ;;  %657 = vmatprep.mubr.bf16.mxu1 %v2891_v3  ;;  %v436_v30 = vmul.f32 %v2377_v26, %v3057_v21 }
 0x150   :  { %v2378_v2 = vpop.f32.mrb[10].mxu0  ;;  %v434_v35 = vmul.f32 %v3048_v9, %v315_v28 }
 0x151   :  { %v437_v31 = vmul.f32 %v2378_v2, %v3059_v24  ;;  %v318_v33 = vpop.f32.mrb[11].mxu0 }
 0x152   :  { %v435_v36 = vmul.f32 %v3050_v10, %v318_v33 }
 0x153   :  { %v447_v38 = vpack.c.bf16 %v437_v31, %v436_v30 }
 0x154   :  { %v446_v39 = vpack.c.bf16 %v435_v36, %v434_v35 }
 0x156   :  { %v2381_v40 = vpop.f32.mrb[12].mxu0  ;;  %658 = vmatmul.mubr.bf16.gmra.mrb[8].mxu1 %v444_v25 }
 0x157   :  { %v331_v3 = vpop.f32.mrb[13].mxu0  ;;  %665 = vmatprep.mubr.bf16.mxu1 %v2897_v4  ;;  %v440_v47 = vmul.f32 %v2381_v40, %v3070_v41 }
 0x158   :  { %v2382_v46 = vpop.f32.mrb[14].mxu0  ;;  %v438_v57 = vmul.f32 %v3062_v29, %v331_v3 }
 0x159   :  { %v441_v48 = vmul.f32 %v2382_v46, %v3073_v45  ;;  %v334_v55 = vpop.f32.mrb[15].mxu0 }
 0x15a   :  { %v439_v59 = vmul.f32 %v3066_v34, %v334_v55 }
 0x15b   :  { %v449_v60 = vpack.c.bf16 %v441_v48, %v440_v47 }
 0x15c   :  { %v448_v61 = vpack.c.bf16 %v439_v59, %v438_v57 }
 0x15e   :  { %666 = vmatmul.mubr.bf16.gmra.mrb[12].mxu1 %v445_v23 }
 0x15f   :  { %673 = vmatprep.mubr.bf16.mxu1 %v2911_v6 }
 0x166   :  { %674 = vmatmul.mubr.bf16.gmra.mrb[16].mxu1 %v446_v39 }
 0x167   :  { %681 = vmatprep.mubr.bf16.mxu1 %v2918_v7 }
 0x16e   :  { %682 = vmatmul.mubr.bf16.gmra.mrb[20].mxu1 %v447_v38 }
 0x16f   :  { %689 = vmatprep.mubr.bf16.mxu1 %v2937_v12 }
 0x176   :  { %690 = vmatmul.mubr.bf16.gmra.mrb[24].mxu1 %v448_v61 }
 0x177   :  { %697 = vmatprep.mubr.bf16.mxu1 %v2948_v15 }
 0x17e   :  { %698 = vmatmul.mubr.bf16.gmra.mrb[28].mxu1 %v449_v60 }
 0x17f   :  { %2431 = vmatprep.mubr.bf16.mxu1 %v2903_v5 }
 0x219   :  { %v2107_v4 = vpop.f32.mrb[0].mxu1 }
 0x21a   :  { %v2108_v63 = vpop.f32.mrb[1].mxu1 }
 0x21b   :  { %v2109_v6 = vadd.f32 %v2108_v63, %v2107_v4  ;;  %v2110_v0 = vpop.f32.mrb[2].mxu1 }
 0x21c   :  { %v2111_v1 = vpop.f32.mrb[3].mxu1 }
 0x21d   :  { %v644_v7 = vadd.f32 %v2109_v6, %v3087_v62  ;;  %v2112_v8 = vadd.f32 %v2111_v1, %v2110_v0 }
 0x21f   :  { %v647_v12 = vadd.f32 %v2112_v8, %v3087_v62  ;;  %v706_v11 = vmax.f32 %v644_v7, 0.0 }
 0x221   :  { %v707_v15 = vmax.f32 %v647_v12, 0.0  ;;  %v2113_v13 = vpop.f32.mrb[4].mxu1 }
 0x222   :  { %v2114_v14 = vpop.f32.mrb[5].mxu1 }
 0x223   :  { %v2115_v5 = vadd.f32 %v2114_v14, %v2113_v13  ;;  %v2116_v16 = vpop.f32.mrb[6].mxu1  ;;  %v3091_v17 = vpack.c.bf16 %v707_v15, %v706_v11 }
 0x224   :  { %v2117_v18 = vpop.f32.mrb[7].mxu1 }
 0x225   :  { %v652_v19 = vadd.f32 %v2115_v5, %v3087_v62  ;;  %v2118_v20 = vadd.f32 %v2117_v18, %v2116_v16  ;;  %2383 = vmatprep.subr.bf16.mxu0 %v3091_v17 }
 0x226   :  { %2384 = vmatpush3.bf16.msra.mxu0 %v3091_v17 }
 0x227   :  { %v655_v23 = vadd.f32 %v2118_v20, %v3087_v62  ;;  %v708_v25 = vmax.f32 %v652_v19, 0.0 }
 0x229   :  { %v709_v26 = vmax.f32 %v655_v23, 0.0  ;;  %v2119_v28 = vpop.f32.mrb[8].mxu1 }
 0x22a   :  { %v2120_v2 = vpop.f32.mrb[9].mxu1 }
 0x22b   :  { %v2121_v30 = vadd.f32 %v2120_v2, %v2119_v28  ;;  %v2122_v31 = vpop.f32.mrb[10].mxu1  ;;  %v3097_v33 = vpack.c.bf16 %v709_v26, %v708_v25 }
 0x22c   :  { %v2123_v35 = vpop.f32.mrb[11].mxu1 }
 0x22d   :  { %v660_v36 = vadd.f32 %v2121_v30, %v3087_v62  ;;  %v2124_v38 = vadd.f32 %v2123_v35, %v2122_v31  ;;  %2385 = vmatprep.subr.bf16.mxu0 %v3097_v33 }
 0x22e   :  { %2386 = vmatpush3.bf16.msra.mxu0 %v3097_v33 }
 0x22f   :  { %v663_v39 = vadd.f32 %v2124_v38, %v3087_v62  ;;  %v710_v40 = vmax.f32 %v660_v36, 0.0 }
 0x231   :  { %v711_v3 = vmax.f32 %v663_v39, 0.0  ;;  %v2125_v46 = vpop.f32.mrb[12].mxu1 }
 0x232   :  { %v2126_v47 = vpop.f32.mrb[13].mxu1 }
 0x233   :  { %v2127_v48 = vadd.f32 %v2126_v47, %v2125_v46  ;;  %v2128_v55 = vpop.f32.mrb[14].mxu1  ;;  %v3103_v57 = vpack.c.bf16 %v711_v3, %v710_v40 }
 0x234   :  { %v2129_v59 = vpop.f32.mrb[15].mxu1 }
 0x235   :  { %v668_v60 = vadd.f32 %v2127_v48, %v3087_v62  ;;  %v2130_v61 = vadd.f32 %v2129_v59, %v2128_v55  ;;  %2387 = vmatprep.subr.bf16.mxu0 %v3103_v57 }
 0x236   :  { %2388 = vmatpush3.bf16.msra.mxu0 %v3103_v57 }
 0x237   :  { %v671_v4 = vadd.f32 %v2130_v61, %v3087_v62  ;;  %v712_v63 = vmax.f32 %v668_v60, 0.0 }
 0x239   :  { %v713_v6 = vmax.f32 %v671_v4, 0.0  ;;  %v2131_v0 = vpop.f32.mrb[16].mxu1 }
 0x23a   :  { %v2132_v1 = vpop.f32.mrb[17].mxu1 }
 0x23b   :  { %v2133_v7 = vadd.f32 %v2132_v1, %v2131_v0  ;;  %v2134_v8 = vpop.f32.mrb[18].mxu1  ;;  %v3109_v12 = vpack.c.bf16 %v713_v6, %v712_v63 }
 0x23c   :  { %v2135_v11 = vpop.f32.mrb[19].mxu1 }
 0x23d   :  { %v676_v15 = vadd.f32 %v2133_v7, %v3087_v62  ;;  %v2136_v13 = vadd.f32 %v2135_v11, %v2134_v8  ;;  %2389 = vmatprep.subr.bf16.mxu0 %v3109_v12 }
 0x23e   :  { %2390 = vmatpush3.bf16.msra.mxu0 %v3109_v12 }
 0x23f   :  { %v679_v14 = vadd.f32 %v2136_v13, %v3087_v62  ;;  %v714_v5 = vmax.f32 %v676_v15, 0.0 }
 0x241   :  { %v715_v16 = vmax.f32 %v679_v14, 0.0  ;;  %v2137_v18 = vpop.f32.mrb[20].mxu1 }
 0x242   :  { %v2138_v19 = vpop.f32.mrb[21].mxu1 }
 0x243   :  { %v2139_v20 = vadd.f32 %v2138_v19, %v2137_v18  ;;  %v2140_v23 = vpop.f32.mrb[22].mxu1  ;;  %v3115_v25 = vpack.c.bf16 %v715_v16, %v714_v5  ;;  %v2571_v5 = vld [vmem:[#allocation3 + $0xc0] sm:$0xff]   ;;  %v2573_v18 = vld [vmem:[#allocation3 + $0xc8] sm:$0xff]  }
 0x244   :  { %v2141_v26 = vpop.f32.mrb[23].mxu1  ;;  %v2572_v16 = vld [vmem:[#allocation3 + $0x80] sm:$0xff]   ;;  %v2574_v19 = vld [vmem:[#allocation3 + $0x88] sm:$0xff]  }
 0x245   :  { %v684_v28 = vadd.f32 %v2139_v20, %v3087_v62  ;;  %v2142_v2 = vadd.f32 %v2141_v26, %v2140_v23  ;;  %2391 = vmatprep.subr.bf16.mxu0 %v3115_v25  ;;  %v2576_v20 = vld [vmem:[#allocation3 + $0x90] sm:$0xff]   ;;  %v2577_v23 = vld [vmem:[#allocation3 + $0xd8] sm:$0xff]  }
 0x246   :  { %2392 = vmatpush3.bf16.msra.mxu0 %v3115_v25  ;;  %v2578_v26 = vld [vmem:[#allocation3 + $0x98] sm:$0xff]  }
 0x247   :  { %v687_v30 = vadd.f32 %v2142_v2, %v3087_v62  ;;  %v716_v31 = vmax.f32 %v684_v28, 0.0  ;;  %v2579_v28 = vld [vmem:[#allocation3 + $0xe0] sm:$0xff]   ;;  %v2582_v2 = vld [vmem:[#allocation3 + $0xa8] sm:$0xff]  }
 0x249   :  { %v717_v35 = vmax.f32 %v687_v30, 0.0  ;;  %v2143_v36 = vpop.f32.mrb[24].mxu1  ;;  %v2585_v30 = vld [vmem:[#allocation3 + $0xf8] sm:$0xff]  }
 0x24a   :  { %v2144_v38 = vpop.f32.mrb[25].mxu1 }
 0x24b   :  { %v2145_v39 = vadd.f32 %v2144_v38, %v2143_v36  ;;  %v2146_v40 = vpop.f32.mrb[26].mxu1  ;;  %v3121_v3 = vpack.c.bf16 %v717_v35, %v716_v31  ;;  %v2586_v31 = vld [vmem:[#allocation3 + $0xb8] sm:$0xff]  }
 0x24c   :  { %v2147_v46 = vpop.f32.mrb[27].mxu1 }
 0x24d   :  { %v692_v47 = vadd.f32 %v2145_v39, %v3087_v62  ;;  %v2148_v48 = vadd.f32 %v2147_v46, %v2146_v40  ;;  %2393 = vmatprep.subr.bf16.mxu0 %v3121_v3 }
 0x24e   :  { %2394 = vmatpush3.bf16.msra.mxu0 %v3121_v3 }
 0x24f   :  { %v695_v55 = vadd.f32 %v2148_v48, %v3087_v62  ;;  %v718_v59 = vmax.f32 %v692_v47, 0.0 }
 0x251   :  { %v719_v60 = vmax.f32 %v695_v55, 0.0  ;;  %v2149_v61 = vpop.f32.mrb[28].mxu1 }
 0x252   :  { %v2150_v4 = vpop.f32.mrb[29].mxu1 }
 0x253   :  { %v2151_v63 = vadd.f32 %v2150_v4, %v2149_v61  ;;  %v2152_v6 = vpop.f32.mrb[30].mxu1  ;;  %v3127_v0 = vpack.c.bf16 %v719_v60, %v718_v59 }
 0x254   :  { %v2153_v1 = vpop.f32.mrb[31].mxu1 }
 0x255   :  { %v700_v7 = vadd.f32 %v2151_v63, %v3087_v62  ;;  %v2154_v8 = vadd.f32 %v2153_v1, %v2152_v6  ;;  %2395 = vmatprep.subr.bf16.mxu0 %v3127_v0 }
 0x256   :  { %2396 = vmatpush3.bf16.msra.mxu0 %v3127_v0 }
 0x257   :  { %v703_v11 = vadd.f32 %v2154_v8, %v3087_v62  ;;  %v720_v15 = vmax.f32 %v700_v7, 0.0  ;;  %v2575_v62 = vld [vmem:[#allocation3 + $0xd0] sm:$0xff]  }
 0x259   :  { %v721_v13 = vmax.f32 %v703_v11, 0.0 }
 0x25b   :  { %v3133_v14 = vpack.c.bf16 %v721_v13, %v720_v15 }
 0x25d   :  { %2397 = vmatprep.subr.bf16.mxu0 %v3133_v14 }
 0x25e   :  { %2398 = vmatpush3.bf16.msra.mxu0 %v3133_v14 }
 0x25f   :  { %2171 = vmatprep.subr.bf16.mxu0 %v2571_v5 }
 0x261   :  { %2400 = vmatmul.mubr.bf16.vlgmr.msra.gmra.mrb[16].mxu0 %v2963_v22  ;;  %v2580_v22 = vld [vmem:[#allocation3 + $0xa0] sm:$0xff]  }
 0x262   :  { %2403 = vmatprep.mubr.bf16.mxu0 %v2974_v27  ;;  %2172 = vmatpush3.bf16.msra.mxu0 %v2572_v16  ;;  %v2581_v27 = vld [vmem:[#allocation3 + $0xe8] sm:$0xff]  }
 0x263   :  { %2173 = vmatprep.subr.bf16.mxu0 %v2573_v18 }
 0x266   :  { %2174 = vmatpush3.bf16.msra.mxu0 %v2574_v19 }
 0x267   :  { %2175 = vmatprep.subr.bf16.mxu0 %v2575_v62 }
 0x269   :  { %2404 = vmatmul.mubr.bf16.gmra.mrb[20].mxu0 %v2988_v32  ;;  %v2583_v32 = vld [vmem:[#allocation3 + $0xf0] sm:$0xff]  }
 0x26a   :  { %2407 = vmatprep.mubr.bf16.mxu0 %v2999_v37  ;;  %2176 = vmatpush3.bf16.msra.mxu0 %v2576_v20  ;;  %v2584_v37 = vld [vmem:[#allocation3 + $0xb0] sm:$0xff]  }
 0x26b   :  { %2177 = vmatprep.subr.bf16.mxu0 %v2577_v23 }
 0x26e   :  { %2178 = vmatpush3.bf16.msra.mxu0 %v2578_v26 }
 0x26f   :  { %2179 = vmatprep.subr.bf16.mxu0 %v2579_v28 }
 0x271   :  { %2408 = vmatmul.mubr.bf16.gmra.mrb[24].mxu0 %v3012_v42 }
 0x272   :  { %2411 = vmatprep.mubr.bf16.mxu0 %v3017_v43  ;;  %2180 = vmatpush3.bf16.msra.mxu0 %v2580_v22 }
 0x273   :  { %2181 = vmatprep.subr.bf16.mxu0 %v2581_v27 }
 0x276   :  { %2182 = vmatpush3.bf16.msra.mxu0 %v2582_v2 }
 0x277   :  { %2183 = vmatprep.subr.bf16.mxu0 %v2583_v32 }
 0x279   :  { %2412 = vmatmul.mubr.bf16.gmra.mrb[28].mxu0 %v3024_v44 }
 0x27a   :  { %1060 = vmatprep.mubr.bf16.mxu0 %v3091_v17  ;;  %2184 = vmatpush3.bf16.msra.mxu0 %v2584_v37 }
 0x27b   :  { %2185 = vmatprep.subr.bf16.mxu0 %v2585_v30 }
 0x27e   :  { %2186 = vmatpush3.bf16.msra.mxu0 %v2586_v31 }
 0x334   :  { %v2401_v35 = vpop.f32.mrb[16].mxu0 }
 0x335   :  { %v780_v36 = vpop.f32.mrb[17].mxu0  ;;  %v845_v39 = vmul.f32 %v2401_v35, %v3030_v50  ;;  %v3171_v35 = vld [vmem:[%s3300_s4 + $0x1] ss:$0 sm:$0xff] }
 0x336   :  { %v2402_v38 = vpop.f32.mrb[18].mxu0  ;;  %v843_v47 = vmul.f32 %v780_v36, %v3028_v49 }
 0x337   :  { %v846_v40 = vmul.f32 %v2402_v38, %v3034_v52  ;;  %v783_v46 = vpop.f32.mrb[19].mxu0 }
 0x338   :  { %v844_v17 = vmul.f32 %v783_v46, %v3032_v51 }
 0x339   :  { %v860_v48 = vpack.c.bf16 %v846_v40, %v845_v39 }
 0x33a   :  { %v859_v55 = vpack.c.bf16 %v844_v17, %v843_v47 }
 0x33c   :  { %v2405_v59 = vpop.f32.mrb[20].mxu0  ;;  %1061 = vmatmul.mubr.bf16.vlgmr.msra.gmra.mrb[32].mxu0 %v859_v55 }
 0x33d   :  { %v796_v60 = vpop.f32.mrb[21].mxu0  ;;  %1068 = vmatprep.mubr.bf16.mxu0 %v3097_v33  ;;  %v849_v4 = vmul.f32 %v2405_v59, %v3040_v56 }
 0x33e   :  { %v2406_v61 = vpop.f32.mrb[22].mxu0  ;;  %v847_v1 = vmul.f32 %v796_v60, %v3036_v53 }
 0x33f   :  { %v850_v63 = vmul.f32 %v2406_v61, %v3042_v58  ;;  %v799_v6 = vpop.f32.mrb[23].mxu0 }
 0x340   :  { %v848_v7 = vmul.f32 %v799_v6, %v3038_v54 }
 0x341   :  { %v862_v8 = vpack.c.bf16 %v850_v63, %v849_v4 }
 0x342   :  { %v861_v11 = vpack.c.bf16 %v848_v7, %v847_v1 }
 0x344   :  { %v2409_v15 = vpop.f32.mrb[24].mxu0  ;;  %1069 = vmatmul.mubr.bf16.gmra.mrb[36].mxu0 %v860_v48 }
 0x345   :  { %v812_v13 = vpop.f32.mrb[25].mxu0  ;;  %1076 = vmatprep.mubr.bf16.mxu0 %v3103_v57  ;;  %v853_v33 = vmul.f32 %v2409_v15, %v3057_v21 }
 0x346   :  { %v2410_v5 = vpop.f32.mrb[26].mxu0  ;;  %v851_v19 = vmul.f32 %v812_v13, %v3048_v9 }
 0x347   :  { %v854_v16 = vmul.f32 %v2410_v5, %v3059_v24  ;;  %v815_v18 = vpop.f32.mrb[27].mxu0 }
 0x348   :  { %v852_v62 = vmul.f32 %v815_v18, %v3050_v10 }
 0x349   :  { %v864_v20 = vpack.c.bf16 %v854_v16, %v853_v33 }
 0x34a   :  { %v863_v23 = vpack.c.bf16 %v852_v62, %v851_v19 }
 0x34c   :  { %v2413_v26 = vpop.f32.mrb[28].mxu0  ;;  %1077 = vmatmul.mubr.bf16.gmra.mrb[40].mxu0 %v861_v11 }
 0x34d   :  { %v828_v28 = vpop.f32.mrb[29].mxu0  ;;  %1084 = vmatprep.mubr.bf16.mxu0 %v3109_v12  ;;  %v857_v57 = vmul.f32 %v2413_v26, %v3070_v41 }
 0x34e   :  { %v2414_v22 = vpop.f32.mrb[30].mxu0  ;;  %v855_v32 = vmul.f32 %v828_v28, %v3062_v29 }
 0x34f   :  { %v858_v27 = vmul.f32 %v2414_v22, %v3073_v45  ;;  %v831_v2 = vpop.f32.mrb[31].mxu0 }
 0x350   :  { %v856_v37 = vmul.f32 %v831_v2, %v3066_v34 }
 0x351   :  { %v866_v30 = vpack.c.bf16 %v858_v27, %v857_v57 }
 0x352   :  { %v865_v31 = vpack.c.bf16 %v856_v37, %v855_v32 }
 0x354   :  { %1085 = vmatmul.mubr.bf16.gmra.mrb[44].mxu0 %v862_v8 }
 0x355   :  { %1092 = vmatprep.mubr.bf16.mxu0 %v3115_v25 }
 0x35c   :  { %1093 = vmatmul.mubr.bf16.gmra.mrb[48].mxu0 %v863_v23 }
 0x35d   :  { %1100 = vmatprep.mubr.bf16.mxu0 %v3121_v3 }
 0x364   :  { %1101 = vmatmul.mubr.bf16.gmra.mrb[52].mxu0 %v864_v20 }
 0x365   :  { %1108 = vmatprep.mubr.bf16.mxu0 %v3127_v0 }
 0x36c   :  { %1109 = vmatmul.mubr.bf16.gmra.mrb[56].mxu0 %v865_v31 }
 0x36d   :  { %1116 = vmatprep.mubr.bf16.mxu0 %v3133_v14 }
 0x374   :  { %1117 = vmatmul.mubr.bf16.gmra.mrb[60].mxu0 %v866_v30 }
 0x40f   :  { %v2187_v12 = vpop.f32.mrb[32].mxu0 }
 0x410   :  { %v2188_v36 = vpop.f32.mrb[33].mxu0 }
 0x411   :  { %v2189_v38 = vadd.f32 %v2188_v36, %v2187_v12  ;;  %v2190_v39 = vpop.f32.mrb[34].mxu0 }
 0x412   :  { %v2191_v25 = vpop.f32.mrb[35].mxu0 }
 0x413   :  { %v1063_v40 = vadd.f32 %v2189_v38, %v3171_v35  ;;  %v2192_v3 = vadd.f32 %v2191_v25, %v2190_v39 }
 0x415   :  { %v1066_v46 = vadd.f32 %v2192_v3, %v3171_v35  ;;  %v1125_v0 = vmax.f32 %v1063_v40, 0.0 }
 0x417   :  { %v1126_v47 = vmax.f32 %v1066_v46, 0.0  ;;  %v2193_v17 = vpop.f32.mrb[36].mxu0 }
 0x418   :  { %v2194_v14 = vpop.f32.mrb[37].mxu0 }
 0x419   :  { %v2195_v48 = vadd.f32 %v2194_v14, %v2193_v17  ;;  %v2196_v55 = vpop.f32.mrb[38].mxu0  ;;  %v3175_v59 = vpack.c.bf16 %v1126_v47, %v1125_v0 }
 0x41a   :  { %v2197_v60 = vpop.f32.mrb[39].mxu0 }
 0x41b   :  { %v1071_v61 = vadd.f32 %v2195_v48, %v3171_v35  ;;  %v2198_v4 = vadd.f32 %v2197_v60, %v2196_v55  ;;  %2415 = vmatprep.subr.bf16.mxu1 %v3175_v59 }
 0x41c   :  { %2416 = vmatpush3.bf16.msra.mxu1 %v3175_v59 }
 0x41d   :  { %v1074_v63 = vadd.f32 %v2198_v4, %v3171_v35  ;;  %v1127_v6 = vmax.f32 %v1071_v61, 0.0 }
 0x41f   :  { %v1128_v1 = vmax.f32 %v1074_v63, 0.0  ;;  %v2199_v7 = vpop.f32.mrb[40].mxu0 }
 0x420   :  { %v2200_v8 = vpop.f32.mrb[41].mxu0 }
 0x421   :  { %v2201_v11 = vadd.f32 %v2200_v8, %v2199_v7  ;;  %v2202_v15 = vpop.f32.mrb[42].mxu0  ;;  %v3181_v13 = vpack.c.bf16 %v1128_v1, %v1127_v6 }
 0x422   :  { %v2203_v5 = vpop.f32.mrb[43].mxu0 }
 0x423   :  { %v1079_v33 = vadd.f32 %v2201_v11, %v3171_v35  ;;  %v2204_v16 = vadd.f32 %v2203_v5, %v2202_v15  ;;  %2417 = vmatprep.subr.bf16.mxu1 %v3181_v13 }
 0x424   :  { %2418 = vmatpush3.bf16.msra.mxu1 %v3181_v13 }
 0x425   :  { %v1082_v18 = vadd.f32 %v2204_v16, %v3171_v35  ;;  %v1129_v19 = vmax.f32 %v1079_v33, 0.0 }
 0x427   :  { %v1130_v62 = vmax.f32 %v1082_v18, 0.0  ;;  %v2205_v20 = vpop.f32.mrb[44].mxu0 }
 0x428   :  { %v2206_v23 = vpop.f32.mrb[45].mxu0 }
 0x429   :  { %v2207_v26 = vadd.f32 %v2206_v23, %v2205_v20  ;;  %v2208_v28 = vpop.f32.mrb[46].mxu0  ;;  %v3187_v22 = vpack.c.bf16 %v1130_v62, %v1129_v19 }
 0x42a   :  { %v2209_v57 = vpop.f32.mrb[47].mxu0 }
 0x42b   :  { %v1087_v27 = vadd.f32 %v2207_v26, %v3171_v35  ;;  %v2210_v2 = vadd.f32 %v2209_v57, %v2208_v28  ;;  %2419 = vmatprep.subr.bf16.mxu1 %v3187_v22 }
 0x42c   :  { %2420 = vmatpush3.bf16.msra.mxu1 %v3187_v22 }
 0x42d   :  { %v1090_v32 = vadd.f32 %v2210_v2, %v3171_v35  ;;  %v1131_v37 = vmax.f32 %v1087_v27, 0.0 }
 0x42f   :  { %v1132_v30 = vmax.f32 %v1090_v32, 0.0  ;;  %v2211_v31 = vpop.f32.mrb[48].mxu0 }
 0x430   :  { %v2212_v12 = vpop.f32.mrb[49].mxu0 }
 0x431   :  { %v2213_v36 = vadd.f32 %v2212_v12, %v2211_v31  ;;  %v2214_v38 = vpop.f32.mrb[50].mxu0  ;;  %v3193_v39 = vpack.c.bf16 %v1132_v30, %v1131_v37 }
 0x432   :  { %v2215_v25 = vpop.f32.mrb[51].mxu0 }
 0x433   :  { %v1095_v40 = vadd.f32 %v2213_v36, %v3171_v35  ;;  %v2216_v3 = vadd.f32 %v2215_v25, %v2214_v38  ;;  %2421 = vmatprep.subr.bf16.mxu1 %v3193_v39  ;;  %v2587_v25 = vld [vmem:[#allocation3 + $0x140] sm:$0xff]  }
 0x434   :  { %2422 = vmatpush3.bf16.msra.mxu1 %v3193_v39 }
 0x435   :  { %v1098_v46 = vadd.f32 %v2216_v3, %v3171_v35  ;;  %v1133_v0 = vmax.f32 %v1095_v40, 0.0  ;;  %v2588_v40 = vld [vmem:[#allocation3 + $0x100] sm:$0xff]   ;;  %v2589_v3 = vld [vmem:[#allocation3 + $0x148] sm:$0xff]  }
 0x437   :  { %v1134_v47 = vmax.f32 %v1098_v46, 0.0  ;;  %v2217_v17 = vpop.f32.mrb[52].mxu0  ;;  %v2623_v46 = vld [vmem:[%s3296_s0 + $0x8] sm:$0xff]  }
 0x438   :  { %v2218_v14 = vpop.f32.mrb[53].mxu0 }
 0x439   :  { %v2219_v48 = vadd.f32 %v2218_v14, %v2217_v17  ;;  %v2220_v55 = vpop.f32.mrb[54].mxu0  ;;  %v3199_v60 = vpack.c.bf16 %v1134_v47, %v1133_v0  ;;  %v2590_v0 = vld [vmem:[#allocation3 + $0x108] sm:$0xff]   ;;  %v2591_v47 = vld [vmem:[#allocation3 + $0x150] sm:$0xff]   ;;  %v2593_v14 = vld [vmem:[#allocation3 + $0x158] sm:$0xff]  }
 0x43a   :  { %v2221_v61 = vpop.f32.mrb[55].mxu0  ;;  %v2592_v17 = vld [vmem:[#allocation3 + $0x110] sm:$0xff]  }
 0x43b   :  { %v1103_v4 = vadd.f32 %v2219_v48, %v3171_v35  ;;  %v2222_v63 = vadd.f32 %v2221_v61, %v2220_v55  ;;  %2423 = vmatprep.subr.bf16.mxu1 %v3199_v60  ;;  %v2625_v48 = vld [vmem:[%s3296_s0 + $0x18] sm:$0xff]   ;;  %v2626_v55 = vld [vmem:[%s3296_s0 + $0x20] sm:$0xff]  }
 0x43c   :  { %2424 = vmatpush3.bf16.msra.mxu1 %v3199_v60  ;;  %v2594_v61 = vld [vmem:[#allocation3 + $0x118] sm:$0xff]  }
 0x43d   :  { %v1106_v6 = vadd.f32 %v2222_v63, %v3171_v35  ;;  %v1135_v1 = vmax.f32 %v1103_v4, 0.0  ;;  %v2595_v4 = vld [vmem:[#allocation3 + $0x160] sm:$0xff]  }
 0x43e   :  { %v2596_v63 = vld [vmem:[#allocation3 + $0x120] sm:$0xff]  }
 0x43f   :  { %v1136_v7 = vmax.f32 %v1106_v6, 0.0  ;;  %v2223_v8 = vpop.f32.mrb[56].mxu0  ;;  %v2597_v6 = vld [vmem:[#allocation3 + $0x168] sm:$0xff]  }
 0x440   :  { %v2224_v11 = vpop.f32.mrb[57].mxu0 }
 0x441   :  { %v2225_v15 = vadd.f32 %v2224_v11, %v2223_v8  ;;  %v2226_v5 = vpop.f32.mrb[58].mxu0  ;;  %v3205_v33 = vpack.c.bf16 %v1136_v7, %v1135_v1  ;;  %v2598_v1 = vld [vmem:[#allocation3 + $0x128] sm:$0xff]   ;;  %v2599_v7 = vld [vmem:[#allocation3 + $0x170] sm:$0xff]   ;;  %v2601_v11 = vld [vmem:[#allocation3 + $0x178] sm:$0xff]  }
 0x442   :  { %v2227_v16 = vpop.f32.mrb[59].mxu0  ;;  %v2600_v8 = vld [vmem:[#allocation3 + $0x130] sm:$0xff]  }
 0x443   :  { %v1111_v18 = vadd.f32 %v2225_v15, %v3171_v35  ;;  %v2228_v19 = vadd.f32 %v2227_v16, %v2226_v5  ;;  %2425 = vmatprep.subr.bf16.mxu1 %v3205_v33  ;;  %v2602_v15 = vld [vmem:[#allocation3 + $0x138] sm:$0xff]  }
 0x444   :  { %2426 = vmatpush3.bf16.msra.mxu1 %v3205_v33 }
 0x445   :  { %v1114_v62 = vadd.f32 %v2228_v19, %v3171_v35  ;;  %v1137_v20 = vmax.f32 %v1111_v18, 0.0 }
 0x447   :  { %v1138_v23 = vmax.f32 %v1114_v62, 0.0  ;;  %v2229_v26 = vpop.f32.mrb[60].mxu0 }
 0x448   :  { %v2230_v28 = vpop.f32.mrb[61].mxu0 }
 0x449   :  { %v2231_v57 = vadd.f32 %v2230_v28, %v2229_v26  ;;  %v2232_v27 = vpop.f32.mrb[62].mxu0  ;;  %v3211_v2 = vpack.c.bf16 %v1138_v23, %v1137_v20 }
 0x44a   :  { %v2233_v32 = vpop.f32.mrb[63].mxu0 }
 0x44b   :  { %v1119_v37 = vadd.f32 %v2231_v57, %v3171_v35  ;;  %v2234_v30 = vadd.f32 %v2233_v32, %v2232_v27  ;;  %2427 = vmatprep.subr.bf16.mxu1 %v3211_v2 }
 0x44c   :  { %2428 = vmatpush3.bf16.msra.mxu1 %v3211_v2 }
 0x44d   :  { %v1122_v31 = vadd.f32 %v2234_v30, %v3171_v35  ;;  %v1139_v12 = vmax.f32 %v1119_v37, 0.0  ;;  %v2624_v35 = vld [vmem:[%s3296_s0 + $0x10] sm:$0xff]  }
 0x44f   :  { %v1140_v36 = vmax.f32 %v1122_v31, 0.0 }
 0x451   :  { %v3217_v38 = vpack.c.bf16 %v1140_v36, %v1139_v12 }
 0x453   :  { %2429 = vmatprep.subr.bf16.mxu1 %v3217_v38 }
 0x454   :  { %2430 = vmatpush3.bf16.msra.mxu1 %v3217_v38 }
 0x455   :  { %2251 = vmatprep.subr.bf16.mxu1 %v2587_v25 }
 0x457   :  { %2432 = vmatmul.mubr.bf16.vlgmr.msra.gmra.mrb[32].mxu1 %v2623_v46 }
 0x458   :  { %2435 = vmatprep.mubr.bf16.mxu1 %v2624_v35  ;;  %2252 = vmatpush3.bf16.msra.mxu1 %v2588_v40 }
 0x459   :  { %2253 = vmatprep.subr.bf16.mxu1 %v2589_v3 }
 0x45c   :  { %2254 = vmatpush3.bf16.msra.mxu1 %v2590_v0 }
 0x45d   :  { %2255 = vmatprep.subr.bf16.mxu1 %v2591_v47 }
 0x45f   :  { %2436 = vmatmul.mubr.bf16.gmra.mrb[36].mxu1 %v2625_v48 }
 0x460   :  { %2439 = vmatprep.mubr.bf16.mxu1 %v2626_v55  ;;  %2256 = vmatpush3.bf16.msra.mxu1 %v2592_v17 }
 0x461   :  { %2257 = vmatprep.subr.bf16.mxu1 %v2593_v14 }
 0x464   :  { %2258 = vmatpush3.bf16.msra.mxu1 %v2594_v61 }
 0x465   :  { %2259 = vmatprep.subr.bf16.mxu1 %v2595_v4 }
 0x467   :  { %2440 = vmatmul.mubr.bf16.gmra.mrb[40].mxu1 %v3012_v42 }
 0x468   :  { %2443 = vmatprep.mubr.bf16.mxu1 %v3017_v43  ;;  %2260 = vmatpush3.bf16.msra.mxu1 %v2596_v63 }
 0x469   :  { %2261 = vmatprep.subr.bf16.mxu1 %v2597_v6 }
 0x46c   :  { %2262 = vmatpush3.bf16.msra.mxu1 %v2598_v1 }
 0x46d   :  { %2263 = vmatprep.subr.bf16.mxu1 %v2599_v7 }
 0x46f   :  { %2444 = vmatmul.mubr.bf16.gmra.mrb[44].mxu1 %v3024_v44 }
 0x470   :  { %1479 = vmatprep.mubr.bf16.mxu1 %v3175_v59  ;;  %2264 = vmatpush3.bf16.msra.mxu1 %v2600_v8 }
 0x471   :  { %2265 = vmatprep.subr.bf16.mxu1 %v2601_v11 }
 0x474   :  { %2266 = vmatpush3.bf16.msra.mxu1 %v2602_v15 }
 0x52a   :  { %v2433_v5 = vpop.f32.mrb[32].mxu1 }
 0x52b   :  { %v1199_v42 = vpop.f32.mrb[33].mxu1  ;;  %v1264_v43 = vmul.f32 %v2433_v5, %v3030_v50 }
 0x52c   :  { %v2434_v16 = vpop.f32.mrb[34].mxu1  ;;  %v1262_v44 = vmul.f32 %v1199_v42, %v3028_v49 }
 0x52d   :  { %v1265_v18 = vmul.f32 %v2434_v16, %v3034_v52  ;;  %v1202_v19 = vpop.f32.mrb[35].mxu1 }
 0x52e   :  { %v1263_v59 = vmul.f32 %v1202_v19, %v3032_v51 }
 0x52f   :  { %v1279_v62 = vpack.c.bf16 %v1265_v18, %v1264_v43 }
 0x530   :  { %v1278_v20 = vpack.c.bf16 %v1263_v59, %v1262_v44 }
 0x532   :  { %v2437_v23 = vpop.f32.mrb[36].mxu1  ;;  %1480 = vmatmul.mubr.bf16.vlgmr.msra.gmra.mrb[48].mxu1 %v1278_v20 }
 0x533   :  { %v1215_v26 = vpop.f32.mrb[37].mxu1  ;;  %1487 = vmatprep.mubr.bf16.mxu1 %v3181_v13  ;;  %v1268_v57 = vmul.f32 %v2437_v23, %v3040_v56 }
 0x534   :  { %v2438_v28 = vpop.f32.mrb[38].mxu1  ;;  %v1266_v52 = vmul.f32 %v1215_v26, %v3036_v53 }
 0x535   :  { %v1269_v27 = vmul.f32 %v2438_v28, %v3042_v58  ;;  %v1218_v50 = vpop.f32.mrb[39].mxu1 }
 0x536   :  { %v1267_v32 = vmul.f32 %v1218_v50, %v3038_v54 }
 0x537   :  { %v1281_v49 = vpack.c.bf16 %v1269_v27, %v1268_v57 }
 0x538   :  { %v1280_v37 = vpack.c.bf16 %v1267_v32, %v1266_v52 }
 0x53a   :  { %v2441_v51 = vpop.f32.mrb[40].mxu1  ;;  %1488 = vmatmul.mubr.bf16.gmra.mrb[52].mxu1 %v1279_v62 }
 0x53b   :  { %v1231_v30 = vpop.f32.mrb[41].mxu1  ;;  %1495 = vmatprep.mubr.bf16.mxu1 %v3187_v22  ;;  %v1272_v13 = vmul.f32 %v2441_v51, %v3057_v21 }
 0x53c   :  { %v2442_v31 = vpop.f32.mrb[42].mxu1  ;;  %v1270_v58 = vmul.f32 %v1231_v30, %v3048_v9 }
 0x53d   :  { %v1273_v12 = vmul.f32 %v2442_v31, %v3059_v24  ;;  %v1234_v56 = vpop.f32.mrb[43].mxu1 }
 0x53e   :  { %v1271_v36 = vmul.f32 %v1234_v56, %v3050_v10  ;;  %v2603_v10 = vld [vmem:[#allocation6] sm:$0xff]  }
 0x53f   :  { %v1283_v53 = vpack.c.bf16 %v1273_v12, %v1272_v13 }
 0x540   :  { %v1282_v25 = vpack.c.bf16 %v1271_v36, %v1270_v58 }
 0x542   :  { %v2445_v54 = vpop.f32.mrb[44].mxu1  ;;  %1496 = vmatmul.mubr.bf16.gmra.mrb[56].mxu1 %v1280_v37 }
 0x543   :  { %v1247_v40 = vpop.f32.mrb[45].mxu1  ;;  %1503 = vmatprep.mubr.bf16.mxu1 %v3193_v39  ;;  %v1276_v22 = vmul.f32 %v2445_v54, %v3070_v41  ;;  %v2608_v41 = vld [vmem:[#allocation9 + $0x8] sm:$0xff]   ;;  %v2611_v39 = vld [vmem:[#allocation9 + $0x20] sm:$0xff]  }
 0x544   :  { %v2446_v3 = vpop.f32.mrb[46].mxu1  ;;  %v1274_v24 = vmul.f32 %v1247_v40, %v3062_v29  ;;  %v2607_v29 = vld [vmem:[#allocation9] sm:$0xff]  }
 0x545   :  { %v1277_v46 = vmul.f32 %v2446_v3, %v3073_v45  ;;  %v1250_v21 = vpop.f32.mrb[47].mxu1  ;;  %2471 = vmatprep.subr.bf16.mxu0 %v2607_v29  ;;  %v2610_v45 = vld [vmem:[#allocation9 + $0x18] sm:$0xff]  }
 0x546   :  { %v1275_v35 = vmul.f32 %v1250_v21, %v3066_v34  ;;  %2472 = vmatpush3.bf16.msra.mxu0 %v2607_v29  ;;  %v2609_v34 = vld [vmem:[#allocation9 + $0x10] sm:$0xff]  }
 0x547   :  { %v1285_v9 = vpack.c.bf16 %v1277_v46, %v1276_v22  ;;  %2473 = vmatprep.subr.bf16.mxu0 %v2608_v41 }
 0x548   :  { %v1284_v0 = vpack.c.bf16 %v1275_v35, %v1274_v24 }
 0x54a   :  { %1504 = vmatmul.mubr.bf16.gmra.mrb[60].mxu1 %v1281_v49  ;;  %2474 = vmatpush3.bf16.msra.mxu0 %v2608_v41 }
 0x54b   :  { %1511 = vmatprep.mubr.bf16.mxu1 %v3199_v60  ;;  %2475 = vmatprep.subr.bf16.mxu0 %v2609_v34  ;;  %v2612_v60 = vld [vmem:[#allocation9 + $0x28] sm:$0xff]  }
 0x54e   :  { %2476 = vmatpush3.bf16.msra.mxu0 %v2609_v34 }
 0x54f   :  { %2477 = vmatprep.subr.bf16.mxu0 %v2610_v45 }
 0x552   :  { %1512 = vmatmul.mubr.bf16.gmra.mrb[64].mxu1 %v1282_v25  ;;  %2478 = vmatpush3.bf16.msra.mxu0 %v2610_v45 }
 0x553   :  { %1519 = vmatprep.mubr.bf16.mxu1 %v3205_v33  ;;  %2479 = vmatprep.subr.bf16.mxu0 %v2611_v39 }
 0x556   :  { %2480 = vmatpush3.bf16.msra.mxu0 %v2611_v39 }
 0x557   :  { %2481 = vmatprep.subr.bf16.mxu0 %v2612_v60 }
 0x55a   :  { %1520 = vmatmul.mubr.bf16.gmra.mrb[68].mxu1 %v1283_v53  ;;  %2482 = vmatpush3.bf16.msra.mxu0 %v2612_v60 }
 0x55b   :  { %1527 = vmatprep.mubr.bf16.mxu1 %v3211_v2  ;;  %v3263_v2 = vld [vmem:[%s3300_s4 + $0x2] ss:$0 sm:$0xff] }
 0x562   :  { %1528 = vmatmul.mubr.bf16.gmra.mrb[72].mxu1 %v1284_v0 }
 0x563   :  { %1535 = vmatprep.mubr.bf16.mxu1 %v3217_v38 }
 0x56a   :  { %1536 = vmatmul.mubr.bf16.gmra.mrb[76].mxu1 %v1285_v9 }
 0x56b   :  { %2463 = vmatprep.mubr.bf16.mxu1 %v2603_v10 }
 0x605   :  { %v2267_v33 = vpop.f32.mrb[48].mxu1 }
 0x606   :  { %v2268_v38 = vpop.f32.mrb[49].mxu1 }
 0x607   :  { %v2269_v47 = vadd.f32 %v2268_v38, %v2267_v33  ;;  %v2270_v17 = vpop.f32.mrb[50].mxu1 }
 0x608   :  { %v2271_v14 = vpop.f32.mrb[51].mxu1 }
 0x609   :  { %v1482_v48 = vadd.f32 %v2269_v47, %v3263_v2  ;;  %v2272_v55 = vadd.f32 %v2271_v14, %v2270_v17 }
 0x60b   :  { %v1485_v61 = vadd.f32 %v2272_v55, %v3263_v2  ;;  %v1544_v4 = vmax.f32 %v1482_v48, 0.0 }
 0x60d   :  { %v1545_v63 = vmax.f32 %v1485_v61, 0.0  ;;  %v2273_v6 = vpop.f32.mrb[52].mxu1 }
 0x60e   :  { %v2274_v1 = vpop.f32.mrb[53].mxu1 }
 0x60f   :  { %v2275_v7 = vadd.f32 %v2274_v1, %v2273_v6  ;;  %v2276_v8 = vpop.f32.mrb[54].mxu1  ;;  %v1560_v11 = vpack.c.bf16 %v1545_v63, %v1544_v4 }
 0x610   :  { %v2277_v15 = vpop.f32.mrb[55].mxu1 }
 0x611   :  { %v1490_v5 = vadd.f32 %v2275_v7, %v3263_v2  ;;  %v2278_v42 = vadd.f32 %v2277_v15, %v2276_v8  ;;  %2447 = vmatprep.subr.bf16.mxu1 %v1560_v11 }
 0x612   :  { %2448 = vmatpush3.bf16.msra.mxu1 %v1560_v11 }
 0x613   :  { %v1493_v16 = vadd.f32 %v2278_v42, %v3263_v2  ;;  %v1546_v43 = vmax.f32 %v1490_v5, 0.0 }
 0x615   :  { %v1547_v18 = vmax.f32 %v1493_v16, 0.0  ;;  %v2279_v19 = vpop.f32.mrb[56].mxu1 }
 0x616   :  { %v2280_v44 = vpop.f32.mrb[57].mxu1 }
 0x617   :  { %v2281_v59 = vadd.f32 %v2280_v44, %v2279_v19  ;;  %v2282_v62 = vpop.f32.mrb[58].mxu1  ;;  %v1561_v20 = vpack.c.bf16 %v1547_v18, %v1546_v43 }
 0x618   :  { %v2283_v23 = vpop.f32.mrb[59].mxu1 }
 0x619   :  { %v1498_v26 = vadd.f32 %v2281_v59, %v3263_v2  ;;  %v2284_v28 = vadd.f32 %v2283_v23, %v2282_v62  ;;  %2449 = vmatprep.subr.bf16.mxu1 %v1561_v20  ;;  %v2605_v23 = vld [vmem:[#allocation6 + $0x10] sm:$0xff]  }
 0x61a   :  { %2450 = vmatpush3.bf16.msra.mxu1 %v1561_v20  ;;  %v2604_v20 = vld [vmem:[#allocation6 + $0x8] sm:$0xff]  }
 0x61b   :  { %v1501_v57 = vadd.f32 %v2284_v28, %v3263_v2  ;;  %v1548_v27 = vmax.f32 %v1498_v26, 0.0  ;;  %v2606_v26 = vld [vmem:[#allocation6 + $0x18] sm:$0xff]   ;;  %v2613_v28 = vld [vmem:[#allocation9 + $0x30] sm:$0xff]  }
 0x61c   :  { %2483 = vmatprep.subr.bf16.mxu0 %v2613_v28 }
 0x61d   :  { %v1549_v50 = vmax.f32 %v1501_v57, 0.0  ;;  %v2285_v52 = vpop.f32.mrb[60].mxu1  ;;  %2484 = vmatpush3.bf16.msra.mxu0 %v2613_v28  ;;  %v2614_v57 = vld [vmem:[#allocation9 + $0x38] sm:$0xff]  }
 0x61e   :  { %v2286_v32 = vpop.f32.mrb[61].mxu1  ;;  %2485 = vmatprep.subr.bf16.mxu0 %v2614_v57 }
 0x61f   :  { %v2287_v49 = vadd.f32 %v2286_v32, %v2285_v52  ;;  %v2288_v37 = vpop.f32.mrb[62].mxu1  ;;  %v1562_v51 = vpack.c.bf16 %v1549_v50, %v1548_v27  ;;  %v2615_v27 = vld [vmem:[#allocation8] sm:$0xff]  }
 0x620   :  { %v2289_v30 = vpop.f32.mrb[63].mxu1 }
 0x621   :  { %v1506_v31 = vadd.f32 %v2287_v49, %v3263_v2  ;;  %v2290_v13 = vadd.f32 %v2289_v30, %v2288_v37  ;;  %2451 = vmatprep.subr.bf16.mxu1 %v1562_v51  ;;  %2486 = vmatpush3.bf16.msra.mxu0 %v2614_v57 }
 0x622   :  { %2452 = vmatpush3.bf16.msra.mxu1 %v1562_v51  ;;  %2495 = vmatprep.subr.bf16.mxu0 %v2615_v27 }
 0x623   :  { %v1509_v12 = vadd.f32 %v2290_v13, %v3263_v2  ;;  %v1550_v56 = vmax.f32 %v1506_v31, 0.0 }
 0x625   :  { %v1551_v58 = vmax.f32 %v1509_v12, 0.0  ;;  %v2291_v36 = vpop.f32.mrb[64].mxu1 }
 0x626   :  { %v2292_v53 = vpop.f32.mrb[65].mxu1 }
 0x627   :  { %v2293_v25 = vadd.f32 %v2292_v53, %v2291_v36  ;;  %v2294_v54 = vpop.f32.mrb[66].mxu1  ;;  %v1563_v40 = vpack.c.bf16 %v1551_v58, %v1550_v56  ;;  %v2616_v58 = vld [vmem:[#allocation8 + $0x8] sm:$0xff]   ;;  %v2617_v36 = vld [vmem:[#allocation8 + $0x10] sm:$0xff]   ;;  %v2618_v53 = vld [vmem:[#allocation8 + $0x18] sm:$0xff]  }
 0x628   :  { %v2295_v3 = vpop.f32.mrb[67].mxu1 }
 0x629   :  { %v1514_v22 = vadd.f32 %v2293_v25, %v3263_v2  ;;  %v2296_v46 = vadd.f32 %v2295_v3, %v2294_v54  ;;  %2453 = vmatprep.subr.bf16.mxu1 %v1563_v40  ;;  %v2619_v25 = vld [vmem:[#allocation8 + $0x20] sm:$0xff]   ;;  %v2620_v54 = vld [vmem:[#allocation8 + $0x28] sm:$0xff]   ;;  %v2622_v3 = vld [vmem:[#allocation8 + $0x38] sm:$0xff]  }
 0x62a   :  { %2454 = vmatpush3.bf16.msra.mxu1 %v1563_v40  ;;  %v2621_v40 = vld [vmem:[#allocation8 + $0x30] sm:$0xff]  }
 0x62b   :  { %v1517_v21 = vadd.f32 %v2296_v46, %v3263_v2  ;;  %v1552_v24 = vmax.f32 %v1514_v22, 0.0  ;;  %v2074_v22 = vld [vmem:[%s3304_s8] ss:$0 sm:$0xff]  ;;  %s2715_s8 = scalar_lea.vmem %s1972_s18, 1024 }
 0x62c   :  { %p2716_p4 = scmp.ne.s32.totalorder %s1972_s18, %s2715_s8  ;;  %p2721_p6 = scmp.lt.s32.totalorder %s2715_s8, %s2715_s8 }
 0x62d   :  { %v1553_v35 = vmax.f32 %v1517_v21, 0.0  ;;  %v2297_v9 = vpop.f32.mrb[68].mxu1 }
 0x62e   :  { %v2298_v0 = vpop.f32.mrb[69].mxu1  ;;  %p2722_p7 = por %p2721_p6, %p2720_p5 }
 0x62f   :  { %v2299_v10 = vadd.f32 %v2298_v0, %v2297_v9  ;;  %v2300_v29 = vpop.f32.mrb[70].mxu1  ;;  %v1564_v41 = vpack.c.bf16 %v1553_v35, %v1552_v24 }
 0x630   :  { %v2301_v34 = vpop.f32.mrb[71].mxu1  ;;  %p2723_p8 = pnand %p2722_p7, %p2716_p4 }
 0x631   :  { %v1522_v45 = vadd.f32 %v2299_v10, %v3263_v2  ;;  %v2302_v39 = vadd.f32 %v2301_v34, %v2300_v29  ;;  %2455 = vmatprep.subr.bf16.mxu1 %v1564_v41 }
 0x632   :  { %2456 = vmatpush3.bf16.msra.mxu1 %v1564_v41 }
 0x633   :  { %v1525_v60 = vadd.f32 %v2302_v39, %v3263_v2  ;;  %v1554_v33 = vmax.f32 %v1522_v45, 0.0 }
 0x635   :  { %v1555_v38 = vmax.f32 %v1525_v60, 0.0  ;;  %v2303_v47 = vpop.f32.mrb[72].mxu1 }
 0x636   :  { %v2304_v17 = vpop.f32.mrb[73].mxu1 }
 0x637   :  { %v2305_v14 = vadd.f32 %v2304_v17, %v2303_v47  ;;  %v2306_v48 = vpop.f32.mrb[74].mxu1  ;;  %v1565_v55 = vpack.c.bf16 %v1555_v38, %v1554_v33 }
 0x638   :  { %v2307_v61 = vpop.f32.mrb[75].mxu1 }
 0x639   :  { %v1530_v4 = vadd.f32 %v2305_v14, %v3263_v2  ;;  %v2308_v63 = vadd.f32 %v2307_v61, %v2306_v48  ;;  %2457 = vmatprep.subr.bf16.mxu1 %v1565_v55 }
 0x63a   :  { %2458 = vmatpush3.bf16.msra.mxu1 %v1565_v55 }
 0x63b   :  { %v1533_v6 = vadd.f32 %v2308_v63, %v3263_v2  ;;  %v1556_v1 = vmax.f32 %v1530_v4, 0.0 }
 0x63d   :  { %v1557_v7 = vmax.f32 %v1533_v6, 0.0  ;;  %v2309_v8 = vpop.f32.mrb[76].mxu1 }
 0x63e   :  { %v2310_v11 = vpop.f32.mrb[77].mxu1 }
 0x63f   :  { %v2311_v15 = vadd.f32 %v2310_v11, %v2309_v8  ;;  %v2312_v5 = vpop.f32.mrb[78].mxu1  ;;  %v1566_v42 = vpack.c.bf16 %v1557_v7, %v1556_v1 }
 0x640   :  { %v2313_v16 = vpop.f32.mrb[79].mxu1 }
 0x641   :  { %v1538_v43 = vadd.f32 %v2311_v15, %v3263_v2  ;;  %v2314_v18 = vadd.f32 %v2313_v16, %v2312_v5  ;;  %2459 = vmatprep.subr.bf16.mxu1 %v1566_v42 }
 0x642   :  { %2460 = vmatpush3.bf16.msra.mxu1 %v1566_v42 }
 0x643   :  { %v1541_v19 = vadd.f32 %v2314_v18, %v3263_v2  ;;  %v1558_v44 = vmax.f32 %v1538_v43, 0.0 }
 0x645   :  { %v1559_v59 = vmax.f32 %v1541_v19, 0.0 }
 0x647   :  { %v1567_v62 = vpack.c.bf16 %v1559_v59, %v1558_v44 }
 0x649   :  { %2461 = vmatprep.subr.bf16.mxu1 %v1567_v62 }
 0x64a   :  { %2462 = vmatpush3.bf16.msra.mxu1 %v1567_v62 }
 0x64d   :  { %2464 = vmatmul.mubr.bf16.vlgmr.msra.gmra.mrb[80].mxu1 %v2604_v20 }
 0x64e   :  { %2467 = vmatprep.mubr.bf16.mxu1 %v2605_v23 }
 0x655   :  { %2468 = vmatmul.mubr.bf16.gmra.mrb[84].mxu1 %v2606_v26 }
 0x720   :  { %v2465_v2 = vpop.f32.mrb[80].mxu1 }
 0x721   :  { %v1650_v50 = vpop.f32.mrb[81].mxu1 }
 0x722   :  { %v2466_v52 = vpop.f32.mrb[82].mxu1 }
 0x723   :  { %v1682_v32 = vpack.c.bf16 %v2466_v52, %v2465_v2  ;;  %v1653_v49 = vpop.f32.mrb[83].mxu1 }
 0x724   :  { %v1681_v37 = vpack.c.bf16 %v1653_v49, %v1650_v50 }
 0x728   :  { %v2469_v51 = vpop.f32.mrb[84].mxu1 }
 0x729   :  { %v1666_v30 = vpop.f32.mrb[85].mxu1 }
 0x72a   :  { %v2470_v31 = vpop.f32.mrb[86].mxu1 }
 0x72b   :  { %v1684_v13 = vpack.c.bf16 %v2470_v31, %v2469_v51  ;;  %v1669_v12 = vpop.f32.mrb[87].mxu1 }
 0x72c   :  { %v1683_v56 = vpack.c.bf16 %v1669_v12, %v1666_v30 }
 0x72e   :  { %2487 = vmatprep.mubr.bf16.mxu0 %v1683_v56 }
 0x72f   :  { %2488 = vmatmul.mubr.bf16.vlgmr.msra.gmra.mrb[64].mxu0 %v1684_v13 }
 0x730   :  { %2496 = vmatpush3.bf16.msra.mxu0 %v2615_v27  ;;  %2491 = vmatprep.mubr.bf16.mxu0 %v1681_v37 }
 0x731   :  { %2497 = vmatprep.subr.bf16.mxu0 %v2616_v58 }
 0x734   :  { %2498 = vmatpush3.bf16.msra.mxu0 %v2616_v58 }
 0x735   :  { %2499 = vmatprep.subr.bf16.mxu0 %v2617_v36 }
 0x737   :  { %2492 = vmatmul.mubr.bf16.gmra.mrb[68].mxu0 %v1682_v32 }
 0x738   :  { %2500 = vmatpush3.bf16.msra.mxu0 %v2617_v36  ;;  %2511 = vmatprep.mubr.bf16.mxu0 %v1681_v37 }
 0x739   :  { %2501 = vmatprep.subr.bf16.mxu0 %v2618_v53 }
 0x73c   :  { %2502 = vmatpush3.bf16.msra.mxu0 %v2618_v53 }
 0x73d   :  { %2503 = vmatprep.subr.bf16.mxu0 %v2619_v25 }
 0x740   :  { %2504 = vmatpush3.bf16.msra.mxu0 %v2619_v25 }
 0x741   :  { %2505 = vmatprep.subr.bf16.mxu0 %v2620_v54 }
 0x744   :  { %2506 = vmatpush3.bf16.msra.mxu0 %v2620_v54 }
 0x745   :  { %2507 = vmatprep.subr.bf16.mxu0 %v2621_v40 }
 0x748   :  { %2508 = vmatpush3.bf16.msra.mxu0 %v2621_v40 }
 0x749   :  { %2509 = vmatprep.subr.bf16.mxu0 %v2622_v3 }
 0x74c   :  { %2510 = vmatpush3.bf16.msra.mxu0 %v2622_v3 }
 0x74f   :  { %2512 = vmatmul.mubr.bf16.vlgmr.msra.gmra.mrb[64].mxu0 %v1682_v32 }
 0x750   :  { %2515 = vmatprep.mubr.bf16.mxu0 %v1683_v56 }
 0x757   :  { %2516 = vmatmul.mubr.bf16.gmra.mrb[68].mxu0 %v1684_v13 }
 0x822   :  { %v2513_v46 = vpop.f32.mrb[64].mxu0 }
 0x823   :  { %v1952_v21 = vadd.f32 %v2513_v46, %v2074_v22  ;;  %v1912_v24 = vpop.f32.mrb[65].mxu0 }
 0x824   :  { %v1950_v35 = vadd.f32 %v2074_v22, %v1912_v24  ;;  %v2514_v9 = vpop.f32.mrb[66].mxu0 }
 0x825   :  { %1960 = vst [vmem:[#allocation11 + $0x10] sm:$0xff] %v1952_v21  ;;  %v1953_v0 = vadd.f32 %v2514_v9, %v2074_v22  ;;  %v1915_v10 = vpop.f32.mrb[67].mxu0 }
 0x826   :  { %1958 = vst [vmem:[#allocation11] sm:$0xff] %v1950_v35  ;;  %v1951_v29 = vadd.f32 %v2074_v22, %v1915_v10 }
 0x827   :  { %1961 = vst [vmem:[#allocation11 + $0x18] sm:$0xff] %v1953_v0 }
 0x828   :  { %1959 = vst [vmem:[#allocation11 + $0x8] sm:$0xff] %v1951_v29 }
 0x82a   :  { %v2517_v41 = vpop.f32.mrb[68].mxu0 }
 0x82b   :  { %v1956_v34 = vadd.f32 %v2517_v41, %v2074_v22  ;;  %v1928_v45 = vpop.f32.mrb[69].mxu0 }
 0x82c   :  { %v1954_v39 = vadd.f32 %v2074_v22, %v1928_v45  ;;  %v2518_v60 = vpop.f32.mrb[70].mxu0 }
 0x82d   :  { %1964 = vst [vmem:[#allocation11 + $0x30] sm:$0xff] %v1956_v34  ;;  %v1957_v33 = vadd.f32 %v2518_v60, %v2074_v22  ;;  %v1931_v38 = vpop.f32.mrb[71].mxu0 }
 0x82e   :  { %1962 = vst [vmem:[#allocation11 + $0x20] sm:$0xff] %v1954_v39  ;;  %v1955_v47 = vadd.f32 %v2074_v22, %v1931_v38 }
 0x82f   :  { %1965 = vst [vmem:[#allocation11 + $0x38] sm:$0xff] %v1957_v33 }
 0x830   :  { %1963 = vst [vmem:[#allocation11 + $0x28] sm:$0xff] %v1955_v47 }
 0x831   :  { %2726 = shalt.err (!%p2723_p8)
}
 0x832   :  { %s2727_s7 = scalar_lea.hbm %s3305_s9, 1024 }
 0x833   :  { %p2728_p9 = scmp.ne.s32.totalorder %s3305_s9, %s2727_s7  ;;  %p2731_p10 = scmp.lt.u32.totalorder %s2727_s7, %s3305_s9 }
 0x835   :  { %p2733_p11 = pnand %p2731_p10, %p2728_p9 }
 0x837   :  { %2736 = shalt.err (!%p2733_p11)
}
 0x838   :  { %s2753_s1 = smov 128   ;;  %s2754_s24 = smov 8  }
 0x839   :  { %1977 = dma.vmem_to_hbm [thread:$0]  %s1972_s18, 1024, %s3305_s9, [#allocation5], %s2753_s1, %s2753_s1, %s2754_s24  }
 0x83a   :  { %2743 = dma.done.wait [#allocation5], 1024  }
 0x83b   :  { %2744 = vsyncadd [#allocation5], 4294966272 }
 0x83c   :  { %1981 = vsyncpa [#allocation4], 1 }
 0x83d   :  { %1982 = vsyncpa [#allocation7], 1 }
 0x83e   :  { %1983 = vsyncpa [#allocation10], 1 }
 0x83f   :  { %1984 = vsyncpa [#allocation5], 1 }

</bundles_post_ra>
